<compile_context>
chip_gen: v5e
topology: v5e:2x2
jax: 0.10.0
libtpu: 0.0.40
codegen_flags: <defaults>
</compile_context>

<pallas_src>
import functools

import jax
import jax.numpy as jnp
from jax import lax
from jax.experimental import pallas as pl
from jax.experimental.pallas import tpu as pltpu


def _sigmoid(z):
    # Mathematically identical to logistic sigmoid; routes through the EUP
    # (tanh) instead of exp + VPU divide, and never produces inf.
    return 0.5 * (jnp.tanh(0.5 * z) + 1.0)


# ----------------------------------------------------------------------------
# Pallas kernel: BatchNorm1d (training-mode batch stats) -> LSTM1 -> Linear ->
#                LSTM2 (zero inputs, given (h0, c0)) -> Linear to means.
# Single invocation (no grid); everything fits VMEM at these sizes.
# ----------------------------------------------------------------------------
def lstm_encoder_kernel(
    x_ref,       # (T*B, D)  f32   input sequence, time-major flattened
    gb_ref,      # (2, D)          row 0: BatchNorm gamma, row 1: beta
    wih1_ref,    # (4, D, H1)      LSTM1 W_ih^T per gate (i, f, g, o)
    whh1_ref,    # (4, H1, H1)     LSTM1 W_hh^T per gate
    b1_ref,      # (4, 1, H1)      LSTM1 (b_ih + b_hh) per gate
    wlin_ref,    # (H1, H2)        hidden_layer_to_initial W^T
    blin_ref,    # (1, H2)
    whh2_ref,    # (4, H2, H2)     LSTM2 W_hh^T per gate
    b2_ref,      # (4, 1, H2)      LSTM2 (b_ih + b_hh) per gate
    wout_ref,    # (H2, L)         to_mean W^T
    bout_ref,    # (1, L)
    out_ref,     # (T*B, L)  f32   output means, time-major flattened
    xpi_scr,     # VMEM (T*B, H1)  hoisted input projection, gate i
    xpf_scr,     # VMEM (T*B, H1)  gate f
    xpg_scr,     # VMEM (T*B, H1)  gate g
    xpo_scr,     # VMEM (T*B, H1)  gate o
    h2_scr,      # VMEM (T*B, H2)  LSTM2 hidden-state history
    *, T, B,
):
    f32 = jnp.float32
    H1 = whh1_ref.shape[1]
    H2 = whh2_ref.shape[1]

    # --- BatchNorm1d, training mode: per-channel stats over all (t, b) ---
    x = x_ref[...]                                            # (T*B, D)
    mean = jnp.mean(x, axis=0, keepdims=True)                 # (1, D)
    var = jnp.mean((x - mean) ** 2, axis=0, keepdims=True)    # biased variance
    gamma = gb_ref[0:1, :]
    beta = gb_ref[1:2, :]
    scale = gamma * lax.rsqrt(var + 1e-5)                     # (1, D)
    xn = (x - mean) * scale + beta                            # (T*B, D), registers only

    # --- Hoisted LSTM1 input projection: one GEMM per gate, bias folded in ---
    xpi_scr[...] = jnp.dot(xn, wih1_ref[0], preferred_element_type=f32) + b1_ref[0]
    xpf_scr[...] = jnp.dot(xn, wih1_ref[1], preferred_element_type=f32) + b1_ref[1]
    xpg_scr[...] = jnp.dot(xn, wih1_ref[2], preferred_element_type=f32) + b1_ref[2]
    xpo_scr[...] = jnp.dot(xn, wih1_ref[3], preferred_element_type=f32) + b1_ref[3]

    # Hoist recurrent weight loads out of the unrolled loops.
    wi1, wf1, wg1, wo1 = whh1_ref[0], whh1_ref[1], whh1_ref[2], whh1_ref[3]

    # --- LSTM #1 recurrence (h0 = c0 = 0), fully unrolled ---
    h1 = jnp.zeros((B, H1), f32)
    c1 = jnp.zeros((B, H1), f32)
    for t in range(T):
        r0, r1 = t * B, (t + 1) * B
        gi = xpi_scr[r0:r1, :] + jnp.dot(h1, wi1, preferred_element_type=f32)
        gf = xpf_scr[r0:r1, :] + jnp.dot(h1, wf1, preferred_element_type=f32)
        gg = xpg_scr[r0:r1, :] + jnp.dot(h1, wg1, preferred_element_type=f32)
        go = xpo_scr[r0:r1, :] + jnp.dot(h1, wo1, preferred_element_type=f32)
        i = _sigmoid(gi)
        f = _sigmoid(gf)
        g = jnp.tanh(gg)
        o = _sigmoid(go)
        c1 = f * c1 + i * g
        h1 = o * jnp.tanh(c1)

    # --- Linear: last hidden state -> LSTM2 initial hidden state ---
    init_h = jnp.dot(h1, wlin_ref[...], preferred_element_type=f32) + blin_ref[...]

    wi2, wf2, wg2, wo2 = whh2_ref[0], whh2_ref[1], whh2_ref[2], whh2_ref[3]
    bi2, bf2, bg2, bo2 = b2_ref[0], b2_ref[1], b2_ref[2], b2_ref[3]

    # --- LSTM #2 driven by all-zero dummy inputs: W_ih2 @ 0 == 0 exactly, so
    #     only the combined biases and the recurrent term contribute. ---
    h2 = init_h
    c2 = jnp.ones((B, H2), f32)                               # dummy_initial_cxs
    for t in range(T):
        gi = jnp.dot(h2, wi2, preferred_element_type=f32) + bi2
        gf = jnp.dot(h2, wf2, preferred_element_type=f32) + bf2
        gg = jnp.dot(h2, wg2, preferred_element_type=f32) + bg2
        go = jnp.dot(h2, wo2, preferred_element_type=f32) + bo2
        i = _sigmoid(gi)
        f = _sigmoid(gf)
        g = jnp.tanh(gg)
        o = _sigmoid(go)
        c2 = f * c2 + i * g
        h2 = o * jnp.tanh(c2)
        h2_scr[t * B:(t + 1) * B, :] = h2

    # --- Hoisted to_mean projection: one GEMM + one bulk output store ---
    means = jnp.dot(h2_scr[...], wout_ref[...], preferred_element_type=f32) + bout_ref[...]
    out_ref[...] = means


# ----------------------------------------------------------------------------
# Wrapper (glue: layout/transposes, per-gate weight stacking, pallas_call)
# ----------------------------------------------------------------------------
def lstm_encoder_forward(x_btd, p):
    B, T, D = x_btd.shape
    H1 = p["whh1"].shape[1]
    H2 = p["whh2"].shape[1]
    L = p["wout"].shape[0]
    TB = T * B

    # time-major, flattened: row t*B + b  <->  (t, b)
    x_flat = jnp.transpose(x_btd, (1, 0, 2)).reshape(TB, D).astype(jnp.float32)

    # Per-gate weight stacks, pre-transposed so the kernel computes x @ W.
    # PyTorch LSTM gate order along dim 0 is (i, f, g, o).
    wih1 = jnp.transpose(p["wih1"].reshape(4, H1, D), (0, 2, 1))    # (4, D, H1)
    whh1 = jnp.transpose(p["whh1"].reshape(4, H1, H1), (0, 2, 1))   # (4, H1, H1)
    b1 = (p["bih1"] + p["bhh1"]).reshape(4, 1, H1)
    whh2 = jnp.transpose(p["whh2"].reshape(4, H2, H2), (0, 2, 1))   # (4, H2, H2)
    b2 = (p["bih2"] + p["bhh2"]).reshape(4, 1, H2)

    args = (
        x_flat,
        jnp.stack([p["gamma"], p["beta"]], axis=0),                 # (2, D)
        wih1, whh1, b1,
        p["wlin"].T,                                                # (H1, H2)
        p["blin"].reshape(1, H2),
        whh2, b2,
        p["wout"].T,                                                # (H2, L)
        p["bout"].reshape(1, L),
    )

    kernel = functools.partial(lstm_encoder_kernel, T=T, B=B)

    out_flat = pl.pallas_call(
        kernel,
        out_shape=jax.ShapeDtypeStruct((TB, L), jnp.float32),
        in_specs=[pl.BlockSpec(memory_space=pltpu.MemorySpace.VMEM)] * len(args),
        out_specs=pl.BlockSpec(memory_space=pltpu.MemorySpace.VMEM),
        scratch_shapes=[
            pltpu.VMEM((TB, H1), jnp.float32),   # xp gate i
            pltpu.VMEM((TB, H1), jnp.float32),   # xp gate f
            pltpu.VMEM((TB, H1), jnp.float32),   # xp gate g
            pltpu.VMEM((TB, H1), jnp.float32),   # xp gate o
            pltpu.VMEM((TB, H2), jnp.float32),   # LSTM2 hidden history
        ],
    )(*args)

    return jnp.transpose(out_flat.reshape(T, B, L), (1, 0, 2))      # (B, T, L)


# ----------------------------------------------------------------------------
# Pure-JAX reference mirroring the PyTorch forward (for correctness check)
# ----------------------------------------------------------------------------
def reference_forward(x_btd, p):
    B, T, D = x_btd.shape

    # BatchNorm1d (training mode) on (B, C=D, T)
    xc = jnp.transpose(x_btd, (0, 2, 1))
    mean = jnp.mean(xc, axis=(0, 2), keepdims=True)
    var = jnp.mean((xc - mean) ** 2, axis=(0, 2), keepdims=True)
    xn = (xc - mean) / jnp.sqrt(var + 1e-5)
    xn = xn * p["gamma"][None, :, None] + p["beta"][None, :, None]
    x = jnp.transpose(xn, (0, 2, 1))                                # (B, T, D)

    def lstm(x_seq, w_ih, w_hh, b_ih, b_hh, h0, c0):
        H = w_hh.shape[1]

        def step(carry, xt):
            h, c = carry
            gates = xt @ w_ih.T + b_ih + h @ w_hh.T + b_hh
            i = _sigmoid(gates[:, :H])
            f = _sigmoid(gates[:, H:2 * H])
            g = jnp.tanh(gates[:, 2 * H:3 * H])
            o = _sigmoid(gates[:, 3 * H:])
            c = f * c + i * g
            h = o * jnp.tanh(c)
            return (h, c), h

        (_, _), hs = lax.scan(step, (h0, c0), jnp.transpose(x_seq, (1, 0, 2)))
        return jnp.transpose(hs, (1, 0, 2))                         # (B, T, H)

    H1 = p["whh1"].shape[1]
    H2 = p["whh2"].shape[1]

    hidden = lstm(x, p["wih1"], p["whh1"], p["bih1"], p["bhh1"],
                  jnp.zeros((B, H1)), jnp.zeros((B, H1)))
    last = hidden[:, -1, :]
    init = last @ p["wlin"].T + p["blin"]
    dummy = jnp.zeros((B, T, 1), jnp.float32)
    dyn = lstm(dummy, p["wih2"], p["whh2"], p["bih2"], p["bhh2"],
               init, jnp.ones((B, H2)))
    return dyn @ p["wout"].T + p["bout"]


# ----------------------------------------------------------------------------
# Deterministic parameter initialization (PyTorch-style uniform bounds)
# ----------------------------------------------------------------------------
def init_params(key, D, H1, H2, L):
    ks = jax.random.split(key, 16)
    u = lambda k, shape, bound: jax.random.uniform(k, shape, jnp.float32, -bound, bound)
    b1 = 1.0 / jnp.sqrt(H1)
    b2 = 1.0 / jnp.sqrt(H2)
    return {
        "gamma": jax.random.uniform(ks[0], (D,), jnp.float32, 0.5, 1.5),
        "beta": 0.1 * jax.random.normal(ks[1], (D,), jnp.float32),
        # LSTM1: input D -> hidden H1
        "wih1": u(ks[2], (4 * H1, D), b1),
        "whh1": u(ks[3], (4 * H1, H1), b1),
        "bih1": u(ks[4], (4 * H1,), b1),
        "bhh1": u(ks[5], (4 * H1,), b1),
        # Linear H1 -> H2
        "wlin": u(ks[6], (H2, H1), 1.0 / jnp.sqrt(H1)),
        "blin": u(ks[7], (H2,), 1.0 / jnp.sqrt(H1)),
        # LSTM2: input 1 -> hidden H2 (input weight unused at runtime: inputs are 0)
        "wih2": u(ks[8], (4 * H2, 1), b2),
        "whh2": u(ks[9], (4 * H2, H2), b2),
        "bih2": u(ks[10], (4 * H2,), b2),
        "bhh2": u(ks[11], (4 * H2,), b2),
        # Linear H2 -> L
        "wout": u(ks[12], (L, H2), 1.0 / jnp.sqrt(H2)),
        "bout": u(ks[13], (L,), 1.0 / jnp.sqrt(H2)),
    }


if __name__ == "__main__":
    B, T, D = 2, 8, 4          # batch, timesteps, observed_dims
    H1, H2, L = 10, 10, 3      # data_to_init_hidden, hidden_to_posterior, latent_dims

    key = jax.random.PRNGKey(0)
    kp, kx = jax.random.split(key)
    params = init_params(kp, D, H1, H2, L)
    x = jax.random.normal(kx, (B, T, D), jnp.float32)

    out = jax.block_until_ready(lstm_encoder_forward(x, params))
    ref = reference_forward(x, params)

    assert out.shape == (B, T, L), out.shape
    assert jnp.allclose(out, ref, atol=1e-4, rtol=1e-4), (
        "mismatch", float(jnp.max(jnp.abs(out - ref))))
    print("KERNEL_OK")
</pallas_src>

<mosaic_0001>
module attributes {stable_mosaic.version = 11 : i64} {
  func.func @lstm_encoder_kernel(%arg0: memref<16x4xf32, #tpu.memory_space<vmem>>, %arg1: memref<2x4xf32, #tpu.memory_space<vmem>>, %arg2: memref<4x4x10xf32, #tpu.memory_space<vmem>>, %arg3: memref<4x10x10xf32, #tpu.memory_space<vmem>>, %arg4: memref<4x1x10xf32, #tpu.memory_space<vmem>>, %arg5: memref<10x10xf32, #tpu.memory_space<vmem>>, %arg6: memref<1x10xf32, #tpu.memory_space<vmem>>, %arg7: memref<4x10x10xf32, #tpu.memory_space<vmem>>, %arg8: memref<4x1x10xf32, #tpu.memory_space<vmem>>, %arg9: memref<10x3xf32, #tpu.memory_space<vmem>>, %arg10: memref<1x3xf32, #tpu.memory_space<vmem>>, %arg11: memref<16x3xf32, #tpu.memory_space<vmem>>, %arg12: memref<16x10xf32, #tpu.memory_space<vmem>>, %arg13: memref<16x10xf32, #tpu.memory_space<vmem>>, %arg14: memref<16x10xf32, #tpu.memory_space<vmem>>, %arg15: memref<16x10xf32, #tpu.memory_space<vmem>>, %arg16: memref<16x10xf32, #tpu.memory_space<vmem>>) attributes {dimension_semantics = [], scalar_prefetch = 0 : i64, scratch_operands = 5 : i64, tpu.core_type = #tpu.core_type<tc>} {
    %c0 = arith.constant 0 : index
    %c0_0 = arith.constant 0 : index
    %0 = vector.load %arg0[%c0, %c0_0] : memref<16x4xf32, #tpu.memory_space<vmem>>, vector<16x4xf32>
    %cst = arith.constant dense<0.000000e+00> : vector<4xf32>
    %1 = vector.multi_reduction <add>, %0, %cst [0] : vector<16x4xf32> to vector<4xf32>
    %2 = vector.shape_cast %1 : vector<4xf32> to vector<1x4xf32>
    %cst_1 = arith.constant 1.600000e+01 : f32
    %3 = vector.broadcast %cst_1 : f32 to vector<1x4xf32>
    %4 = arith.divf %2, %3 : vector<1x4xf32>
    %5 = vector.broadcast %4 : vector<1x4xf32> to vector<16x4xf32>
    %6 = arith.subf %0, %5 : vector<16x4xf32>
    %7 = arith.mulf %6, %6 : vector<16x4xf32>
    %cst_2 = arith.constant dense<0.000000e+00> : vector<4xf32>
    %8 = vector.multi_reduction <add>, %7, %cst_2 [0] : vector<16x4xf32> to vector<4xf32>
    %9 = vector.shape_cast %8 : vector<4xf32> to vector<1x4xf32>
    %cst_3 = arith.constant 1.600000e+01 : f32
    %10 = vector.broadcast %cst_3 : f32 to vector<1x4xf32>
    %11 = arith.divf %9, %10 : vector<1x4xf32>
    %c0_4 = arith.constant 0 : index
    %c0_5 = arith.constant 0 : index
    %12 = vector.load %arg1[%c0_4, %c0_5] : memref<2x4xf32, #tpu.memory_space<vmem>>, vector<1x4xf32>
    %c1 = arith.constant 1 : index
    %c0_6 = arith.constant 0 : index
    %13 = vector.load %arg1[%c1, %c0_6] : memref<2x4xf32, #tpu.memory_space<vmem>>, vector<1x4xf32>
    %cst_7 = arith.constant 9.99999974E-6 : f32
    %14 = vector.broadcast %cst_7 : f32 to vector<1x4xf32>
    %15 = arith.addf %11, %14 : vector<1x4xf32>
    %16 = math.rsqrt %15 : vector<1x4xf32>
    %17 = arith.mulf %12, %16 : vector<1x4xf32>
    %18 = vector.broadcast %4 : vector<1x4xf32> to vector<16x4xf32>
    %19 = arith.subf %0, %18 : vector<16x4xf32>
    %20 = vector.broadcast %17 : vector<1x4xf32> to vector<16x4xf32>
    %21 = arith.mulf %19, %20 : vector<16x4xf32>
    %22 = vector.broadcast %13 : vector<1x4xf32> to vector<16x4xf32>
    %23 = arith.addf %21, %22 : vector<16x4xf32>
    %c0_8 = arith.constant 0 : index
    %c0_9 = arith.constant 0 : index
    %c0_10 = arith.constant 0 : index
    %24 = vector.load %arg2[%c0_8, %c0_9, %c0_10] : memref<4x4x10xf32, #tpu.memory_space<vmem>>, vector<1x4x10xf32>
    %25 = vector.shape_cast %24 : vector<1x4x10xf32> to vector<4x10xf32>
    %cst_11 = arith.constant dense<0.000000e+00> : vector<16x10xf32>
    %26 = tpu.matmul %23, %25, %cst_11 {dimension_numbers = #tpu.dot_dimension_numbers<[1], [0], [0], [1], [0, 0, 1, 1], [], []>} : vector<16x4xf32>, vector<4x10xf32>, vector<16x10xf32> -> vector<16x10xf32>
    %c0_12 = arith.constant 0 : index
    %c0_13 = arith.constant 0 : index
    %c0_14 = arith.constant 0 : index
    %27 = vector.load %arg4[%c0_12, %c0_13, %c0_14] : memref<4x1x10xf32, #tpu.memory_space<vmem>>, vector<1x1x10xf32>
    %28 = vector.shape_cast %27 : vector<1x1x10xf32> to vector<1x10xf32>
    %29 = vector.broadcast %28 : vector<1x10xf32> to vector<16x10xf32>
    %30 = arith.addf %26, %29 : vector<16x10xf32>
    %c0_15 = arith.constant 0 : index
    %c0_16 = arith.constant 0 : index
    %31 = vector.load %arg12[%c0_15, %c0_16] : memref<16x10xf32, #tpu.memory_space<vmem>>, vector<16x10xf32>
    tpu.vector_store %arg12[%c0_15, %c0_16], %30 {strides = array<i32>} : memref<16x10xf32, #tpu.memory_space<vmem>>, vector<16x10xf32>,
    %c1_17 = arith.constant 1 : index
    %c0_18 = arith.constant 0 : index
    %c0_19 = arith.constant 0 : index
    %32 = vector.load %arg2[%c1_17, %c0_18, %c0_19] : memref<4x4x10xf32, #tpu.memory_space<vmem>>, vector<1x4x10xf32>
    %33 = vector.shape_cast %32 : vector<1x4x10xf32> to vector<4x10xf32>
    %cst_20 = arith.constant dense<0.000000e+00> : vector<16x10xf32>
    %34 = tpu.matmul %23, %33, %cst_20 {dimension_numbers = #tpu.dot_dimension_numbers<[1], [0], [0], [1], [0, 0, 1, 1], [], []>} : vector<16x4xf32>, vector<4x10xf32>, vector<16x10xf32> -> vector<16x10xf32>
    %c1_21 = arith.constant 1 : index
    %c0_22 = arith.constant 0 : index
    %c0_23 = arith.constant 0 : index
    %35 = vector.load %arg4[%c1_21, %c0_22, %c0_23] : memref<4x1x10xf32, #tpu.memory_space<vmem>>, vector<1x1x10xf32>
    %36 = vector.shape_cast %35 : vector<1x1x10xf32> to vector<1x10xf32>
    %37 = vector.broadcast %36 : vector<1x10xf32> to vector<16x10xf32>
    %38 = arith.addf %34, %37 : vector<16x10xf32>
    %c0_24 = arith.constant 0 : index
    %c0_25 = arith.constant 0 : index
    %39 = vector.load %arg13[%c0_24, %c0_25] : memref<16x10xf32, #tpu.memory_space<vmem>>, vector<16x10xf32>
    tpu.vector_store %arg13[%c0_24, %c0_25], %38 {strides = array<i32>} : memref<16x10xf32, #tpu.memory_space<vmem>>, vector<16x10xf32>,
    %c2 = arith.constant 2 : index
    %c0_26 = arith.constant 0 : index
    %c0_27 = arith.constant 0 : index
    %40 = vector.load %arg2[%c2, %c0_26, %c0_27] : memref<4x4x10xf32, #tpu.memory_space<vmem>>, vector<1x4x10xf32>
    %41 = vector.shape_cast %40 : vector<1x4x10xf32> to vector<4x10xf32>
    %cst_28 = arith.constant dense<0.000000e+00> : vector<16x10xf32>
    %42 = tpu.matmul %23, %41, %cst_28 {dimension_numbers = #tpu.dot_dimension_numbers<[1], [0], [0], [1], [0, 0, 1, 1], [], []>} : vector<16x4xf32>, vector<4x10xf32>, vector<16x10xf32> -> vector<16x10xf32>
    %c2_29 = arith.constant 2 : index
    %c0_30 = arith.constant 0 : index
    %c0_31 = arith.constant 0 : index
    %43 = vector.load %arg4[%c2_29, %c0_30, %c0_31] : memref<4x1x10xf32, #tpu.memory_space<vmem>>, vector<1x1x10xf32>
    %44 = vector.shape_cast %43 : vector<1x1x10xf32> to vector<1x10xf32>
    %45 = vector.broadcast %44 : vector<1x10xf32> to vector<16x10xf32>
    %46 = arith.addf %42, %45 : vector<16x10xf32>
    %c0_32 = arith.constant 0 : index
    %c0_33 = arith.constant 0 : index
    %47 = vector.load %arg14[%c0_32, %c0_33] : memref<16x10xf32, #tpu.memory_space<vmem>>, vector<16x10xf32>
    tpu.vector_store %arg14[%c0_32, %c0_33], %46 {strides = array<i32>} : memref<16x10xf32, #tpu.memory_space<vmem>>, vector<16x10xf32>,
    %c3 = arith.constant 3 : index
    %c0_34 = arith.constant 0 : index
    %c0_35 = arith.constant 0 : index
    %48 = vector.load %arg2[%c3, %c0_34, %c0_35] : memref<4x4x10xf32, #tpu.memory_space<vmem>>, vector<1x4x10xf32>
    %49 = vector.shape_cast %48 : vector<1x4x10xf32> to vector<4x10xf32>
    %cst_36 = arith.constant dense<0.000000e+00> : vector<16x10xf32>
    %50 = tpu.matmul %23, %49, %cst_36 {dimension_numbers = #tpu.dot_dimension_numbers<[1], [0], [0], [1], [0, 0, 1, 1], [], []>} : vector<16x4xf32>, vector<4x10xf32>, vector<16x10xf32> -> vector<16x10xf32>
    %c3_37 = arith.constant 3 : index
    %c0_38 = arith.constant 0 : index
    %c0_39 = arith.constant 0 : index
    %51 = vector.load %arg4[%c3_37, %c0_38, %c0_39] : memref<4x1x10xf32, #tpu.memory_space<vmem>>, vector<1x1x10xf32>
    %52 = vector.shape_cast %51 : vector<1x1x10xf32> to vector<1x10xf32>
    %53 = vector.broadcast %52 : vector<1x10xf32> to vector<16x10xf32>
    %54 = arith.addf %50, %53 : vector<16x10xf32>
    %c0_40 = arith.constant 0 : index
    %c0_41 = arith.constant 0 : index
    %55 = vector.load %arg15[%c0_40, %c0_41] : memref<16x10xf32, #tpu.memory_space<vmem>>, vector<16x10xf32>
    tpu.vector_store %arg15[%c0_40, %c0_41], %54 {strides = array<i32>} : memref<16x10xf32, #tpu.memory_space<vmem>>, vector<16x10xf32>,
    %c0_42 = arith.constant 0 : index
    %c0_43 = arith.constant 0 : index
    %c0_44 = arith.constant 0 : index
    %56 = vector.load %arg3[%c0_42, %c0_43, %c0_44] : memref<4x10x10xf32, #tpu.memory_space<vmem>>, vector<1x10x10xf32>
    %57 = vector.shape_cast %56 : vector<1x10x10xf32> to vector<10x10xf32>
    %c1_45 = arith.constant 1 : index
    %c0_46 = arith.constant 0 : index
    %c0_47 = arith.constant 0 : index
    %58 = vector.load %arg3[%c1_45, %c0_46, %c0_47] : memref<4x10x10xf32, #tpu.memory_space<vmem>>, vector<1x10x10xf32>
    %59 = vector.shape_cast %58 : vector<1x10x10xf32> to vector<10x10xf32>
    %c2_48 = arith.constant 2 : index
    %c0_49 = arith.constant 0 : index
    %c0_50 = arith.constant 0 : index
    %60 = vector.load %arg3[%c2_48, %c0_49, %c0_50] : memref<4x10x10xf32, #tpu.memory_space<vmem>>, vector<1x10x10xf32>
    %61 = vector.shape_cast %60 : vector<1x10x10xf32> to vector<10x10xf32>
    %c3_51 = arith.constant 3 : index
    %c0_52 = arith.constant 0 : index
    %c0_53 = arith.constant 0 : index
    %62 = vector.load %arg3[%c3_51, %c0_52, %c0_53] : memref<4x10x10xf32, #tpu.memory_space<vmem>>, vector<1x10x10xf32>
    %63 = vector.shape_cast %62 : vector<1x10x10xf32> to vector<10x10xf32>
    %cst_54 = arith.constant 0.000000e+00 : f32
    %64 = vector.broadcast %cst_54 : f32 to vector<2x10xf32>
    %cst_55 = arith.constant 0.000000e+00 : f32
    %65 = vector.broadcast %cst_55 : f32 to vector<2x10xf32>
    %c0_56 = arith.constant 0 : index
    %c0_57 = arith.constant 0 : index
    %66 = vector.load %arg12[%c0_56, %c0_57] : memref<16x10xf32, #tpu.memory_space<vmem>>, vector<2x10xf32>
    %cst_58 = arith.constant dense<0.000000e+00> : vector<2x10xf32>
    %67 = tpu.matmul %64, %57, %cst_58 {dimension_numbers = #tpu.dot_dimension_numbers<[1], [0], [0], [1], [0, 0, 1, 1], [], []>} : vector<2x10xf32>, vector<10x10xf32>, vector<2x10xf32> -> vector<2x10xf32>
    %68 = arith.addf %66, %67 : vector<2x10xf32>
    %c0_59 = arith.constant 0 : index
    %c0_60 = arith.constant 0 : index
    %69 = vector.load %arg13[%c0_59, %c0_60] : memref<16x10xf32, #tpu.memory_space<vmem>>, vector<2x10xf32>
    %cst_61 = arith.constant dense<0.000000e+00> : vector<2x10xf32>
    %70 = tpu.matmul %64, %59, %cst_61 {dimension_numbers = #tpu.dot_dimension_numbers<[1], [0], [0], [1], [0, 0, 1, 1], [], []>} : vector<2x10xf32>, vector<10x10xf32>, vector<2x10xf32> -> vector<2x10xf32>
    %71 = arith.addf %69, %70 : vector<2x10xf32>
    %c0_62 = arith.constant 0 : index
    %c0_63 = arith.constant 0 : index
    %72 = vector.load %arg14[%c0_62, %c0_63] : memref<16x10xf32, #tpu.memory_space<vmem>>, vector<2x10xf32>
    %cst_64 = arith.constant dense<0.000000e+00> : vector<2x10xf32>
    %73 = tpu.matmul %64, %61, %cst_64 {dimension_numbers = #tpu.dot_dimension_numbers<[1], [0], [0], [1], [0, 0, 1, 1], [], []>} : vector<2x10xf32>, vector<10x10xf32>, vector<2x10xf32> -> vector<2x10xf32>
    %74 = arith.addf %72, %73 : vector<2x10xf32>
    %c0_65 = arith.constant 0 : index
    %c0_66 = arith.constant 0 : index
    %75 = vector.load %arg15[%c0_65, %c0_66] : memref<16x10xf32, #tpu.memory_space<vmem>>, vector<2x10xf32>
    %cst_67 = arith.constant dense<0.000000e+00> : vector<2x10xf32>
    %76 = tpu.matmul %64, %63, %cst_67 {dimension_numbers = #tpu.dot_dimension_numbers<[1], [0], [0], [1], [0, 0, 1, 1], [], []>} : vector<2x10xf32>, vector<10x10xf32>, vector<2x10xf32> -> vector<2x10xf32>
    %77 = arith.addf %75, %76 : vector<2x10xf32>
    %cst_68 = arith.constant 5.000000e-01 : f32
    %78 = vector.broadcast %cst_68 : f32 to vector<2x10xf32>
    %79 = arith.mulf %78, %68 : vector<2x10xf32>
    %80 = math.tanh %79 : vector<2x10xf32>
    %cst_69 = arith.constant 1.000000e+00 : f32
    %81 = vector.broadcast %cst_69 : f32 to vector<2x10xf32>
    %82 = arith.addf %80, %81 : vector<2x10xf32>
    %cst_70 = arith.constant 5.000000e-01 : f32
    %83 = vector.broadcast %cst_70 : f32 to vector<2x10xf32>
    %84 = arith.mulf %83, %82 : vector<2x10xf32>
    %cst_71 = arith.constant 5.000000e-01 : f32
    %85 = vector.broadcast %cst_71 : f32 to vector<2x10xf32>
    %86 = arith.mulf %85, %71 : vector<2x10xf32>
    %87 = math.tanh %86 : vector<2x10xf32>
    %cst_72 = arith.constant 1.000000e+00 : f32
    %88 = vector.broadcast %cst_72 : f32 to vector<2x10xf32>
    %89 = arith.addf %87, %88 : vector<2x10xf32>
    %cst_73 = arith.constant 5.000000e-01 : f32
    %90 = vector.broadcast %cst_73 : f32 to vector<2x10xf32>
    %91 = arith.mulf %90, %89 : vector<2x10xf32>
    %92 = math.tanh %74 : vector<2x10xf32>
    %cst_74 = arith.constant 5.000000e-01 : f32
    %93 = vector.broadcast %cst_74 : f32 to vector<2x10xf32>
    %94 = arith.mulf %93, %77 : vector<2x10xf32>
    %95 = math.tanh %94 : vector<2x10xf32>
    %cst_75 = arith.constant 1.000000e+00 : f32
    %96 = vector.broadcast %cst_75 : f32 to vector<2x10xf32>
    %97 = arith.addf %95, %96 : vector<2x10xf32>
    %cst_76 = arith.constant 5.000000e-01 : f32
    %98 = vector.broadcast %cst_76 : f32 to vector<2x10xf32>
    %99 = arith.mulf %98, %97 : vector<2x10xf32>
    %100 = arith.mulf %91, %65 : vector<2x10xf32>
    %101 = arith.mulf %84, %92 : vector<2x10xf32>
    %102 = arith.addf %100, %101 : vector<2x10xf32>
    %103 = math.tanh %102 : vector<2x10xf32>
    %104 = arith.mulf %99, %103 : vector<2x10xf32>
    %c2_77 = arith.constant 2 : index
    %c0_78 = arith.constant 0 : index
    %105 = vector.load %arg12[%c2_77, %c0_78] : memref<16x10xf32, #tpu.memory_space<vmem>>, vector<2x10xf32>
    %cst_79 = arith.constant dense<0.000000e+00> : vector<2x10xf32>
    %106 = tpu.matmul %104, %57, %cst_79 {dimension_numbers = #tpu.dot_dimension_numbers<[1], [0], [0], [1], [0, 0, 1, 1], [], []>} : vector<2x10xf32>, vector<10x10xf32>, vector<2x10xf32> -> vector<2x10xf32>
    %107 = arith.addf %105, %106 : vector<2x10xf32>
    %c2_80 = arith.constant 2 : index
    %c0_81 = arith.constant 0 : index
    %108 = vector.load %arg13[%c2_80, %c0_81] : memref<16x10xf32, #tpu.memory_space<vmem>>, vector<2x10xf32>
    %cst_82 = arith.constant dense<0.000000e+00> : vector<2x10xf32>
    %109 = tpu.matmul %104, %59, %cst_82 {dimension_numbers = #tpu.dot_dimension_numbers<[1], [0], [0], [1], [0, 0, 1, 1], [], []>} : vector<2x10xf32>, vector<10x10xf32>, vector<2x10xf32> -> vector<2x10xf32>
    %110 = arith.addf %108, %109 : vector<2x10xf32>
    %c2_83 = arith.constant 2 : index
    %c0_84 = arith.constant 0 : index
    %111 = vector.load %arg14[%c2_83, %c0_84] : memref<16x10xf32, #tpu.memory_space<vmem>>, vector<2x10xf32>
    %cst_85 = arith.constant dense<0.000000e+00> : vector<2x10xf32>
    %112 = tpu.matmul %104, %61, %cst_85 {dimension_numbers = #tpu.dot_dimension_numbers<[1], [0], [0], [1], [0, 0, 1, 1], [], []>} : vector<2x10xf32>, vector<10x10xf32>, vector<2x10xf32> -> vector<2x10xf32>
    %113 = arith.addf %111, %112 : vector<2x10xf32>
    %c2_86 = arith.constant 2 : index
    %c0_87 = arith.constant 0 : index
    %114 = vector.load %arg15[%c2_86, %c0_87] : memref<16x10xf32, #tpu.memory_space<vmem>>, vector<2x10xf32>
    %cst_88 = arith.constant dense<0.000000e+00> : vector<2x10xf32>
    %115 = tpu.matmul %104, %63, %cst_88 {dimension_numbers = #tpu.dot_dimension_numbers<[1], [0], [0], [1], [0, 0, 1, 1], [], []>} : vector<2x10xf32>, vector<10x10xf32>, vector<2x10xf32> -> vector<2x10xf32>
    %116 = arith.addf %114, %115 : vector<2x10xf32>
    %cst_89 = arith.constant 5.000000e-01 : f32
    %117 = vector.broadcast %cst_89 : f32 to vector<2x10xf32>
    %118 = arith.mulf %117, %107 : vector<2x10xf32>
    %119 = math.tanh %118 : vector<2x10xf32>
    %cst_90 = arith.constant 1.000000e+00 : f32
    %120 = vector.broadcast %cst_90 : f32 to vector<2x10xf32>
    %121 = arith.addf %119, %120 : vector<2x10xf32>
    %cst_91 = arith.constant 5.000000e-01 : f32
    %122 = vector.broadcast %cst_91 : f32 to vector<2x10xf32>
    %123 = arith.mulf %122, %121 : vector<2x10xf32>
    %cst_92 = arith.constant 5.000000e-01 : f32
    %124 = vector.broadcast %cst_92 : f32 to vector<2x10xf32>
    %125 = arith.mulf %124, %110 : vector<2x10xf32>
    %126 = math.tanh %125 : vector<2x10xf32>
    %cst_93 = arith.constant 1.000000e+00 : f32
    %127 = vector.broadcast %cst_93 : f32 to vector<2x10xf32>
    %128 = arith.addf %126, %127 : vector<2x10xf32>
    %cst_94 = arith.constant 5.000000e-01 : f32
    %129 = vector.broadcast %cst_94 : f32 to vector<2x10xf32>
    %130 = arith.mulf %129, %128 : vector<2x10xf32>
    %131 = math.tanh %113 : vector<2x10xf32>
    %cst_95 = arith.constant 5.000000e-01 : f32
    %132 = vector.broadcast %cst_95 : f32 to vector<2x10xf32>
    %133 = arith.mulf %132, %116 : vector<2x10xf32>
    %134 = math.tanh %133 : vector<2x10xf32>
    %cst_96 = arith.constant 1.000000e+00 : f32
    %135 = vector.broadcast %cst_96 : f32 to vector<2x10xf32>
    %136 = arith.addf %134, %135 : vector<2x10xf32>
    %cst_97 = arith.constant 5.000000e-01 : f32
    %137 = vector.broadcast %cst_97 : f32 to vector<2x10xf32>
    %138 = arith.mulf %137, %136 : vector<2x10xf32>
    %139 = arith.mulf %130, %102 : vector<2x10xf32>
    %140 = arith.mulf %123, %131 : vector<2x10xf32>
    %141 = arith.addf %139, %140 : vector<2x10xf32>
    %142 = math.tanh %141 : vector<2x10xf32>
    %143 = arith.mulf %138, %142 : vector<2x10xf32>
    %c4 = arith.constant 4 : index
    %c0_98 = arith.constant 0 : index
    %144 = vector.load %arg12[%c4, %c0_98] : memref<16x10xf32, #tpu.memory_space<vmem>>, vector<2x10xf32>
    %cst_99 = arith.constant dense<0.000000e+00> : vector<2x10xf32>
    %145 = tpu.matmul %143, %57, %cst_99 {dimension_numbers = #tpu.dot_dimension_numbers<[1], [0], [0], [1], [0, 0, 1, 1], [], []>} : vector<2x10xf32>, vector<10x10xf32>, vector<2x10xf32> -> vector<2x10xf32>
    %146 = arith.addf %144, %145 : vector<2x10xf32>
    %c4_100 = arith.constant 4 : index
    %c0_101 = arith.constant 0 : index
    %147 = vector.load %arg13[%c4_100, %c0_101] : memref<16x10xf32, #tpu.memory_space<vmem>>, vector<2x10xf32>
    %cst_102 = arith.constant dense<0.000000e+00> : vector<2x10xf32>
    %148 = tpu.matmul %143, %59, %cst_102 {dimension_numbers = #tpu.dot_dimension_numbers<[1], [0], [0], [1], [0, 0, 1, 1], [], []>} : vector<2x10xf32>, vector<10x10xf32>, vector<2x10xf32> -> vector<2x10xf32>
    %149 = arith.addf %147, %148 : vector<2x10xf32>
    %c4_103 = arith.constant 4 : index
    %c0_104 = arith.constant 0 : index
    %150 = vector.load %arg14[%c4_103, %c0_104] : memref<16x10xf32, #tpu.memory_space<vmem>>, vector<2x10xf32>
    %cst_105 = arith.constant dense<0.000000e+00> : vector<2x10xf32>
    %151 = tpu.matmul %143, %61, %cst_105 {dimension_numbers = #tpu.dot_dimension_numbers<[1], [0], [0], [1], [0, 0, 1, 1], [], []>} : vector<2x10xf32>, vector<10x10xf32>, vector<2x10xf32> -> vector<2x10xf32>
    %152 = arith.addf %150, %151 : vector<2x10xf32>
    %c4_106 = arith.constant 4 : index
    %c0_107 = arith.constant 0 : index
    %153 = vector.load %arg15[%c4_106, %c0_107] : memref<16x10xf32, #tpu.memory_space<vmem>>, vector<2x10xf32>
    %cst_108 = arith.constant dense<0.000000e+00> : vector<2x10xf32>
    %154 = tpu.matmul %143, %63, %cst_108 {dimension_numbers = #tpu.dot_dimension_numbers<[1], [0], [0], [1], [0, 0, 1, 1], [], []>} : vector<2x10xf32>, vector<10x10xf32>, vector<2x10xf32> -> vector<2x10xf32>
    %155 = arith.addf %153, %154 : vector<2x10xf32>
    %cst_109 = arith.constant 5.000000e-01 : f32
    %156 = vector.broadcast %cst_109 : f32 to vector<2x10xf32>
    %157 = arith.mulf %156, %146 : vector<2x10xf32>
    %158 = math.tanh %157 : vector<2x10xf32>
    %cst_110 = arith.constant 1.000000e+00 : f32
    %159 = vector.broadcast %cst_110 : f32 to vector<2x10xf32>
    %160 = arith.addf %158, %159 : vector<2x10xf32>
    %cst_111 = arith.constant 5.000000e-01 : f32
    %161 = vector.broadcast %cst_111 : f32 to vector<2x10xf32>
    %162 = arith.mulf %161, %160 : vector<2x10xf32>
    %cst_112 = arith.constant 5.000000e-01 : f32
    %163 = vector.broadcast %cst_112 : f32 to vector<2x10xf32>
    %164 = arith.mulf %163, %149 : vector<2x10xf32>
    %165 = math.tanh %164 : vector<2x10xf32>
    %cst_113 = arith.constant 1.000000e+00 : f32
    %166 = vector.broadcast %cst_113 : f32 to vector<2x10xf32>
    %167 = arith.addf %165, %166 : vector<2x10xf32>
    %cst_114 = arith.constant 5.000000e-01 : f32
    %168 = vector.broadcast %cst_114 : f32 to vector<2x10xf32>
    %169 = arith.mulf %168, %167 : vector<2x10xf32>
    %170 = math.tanh %152 : vector<2x10xf32>
    %cst_115 = arith.constant 5.000000e-01 : f32
    %171 = vector.broadcast %cst_115 : f32 to vector<2x10xf32>
    %172 = arith.mulf %171, %155 : vector<2x10xf32>
    %173 = math.tanh %172 : vector<2x10xf32>
    %cst_116 = arith.constant 1.000000e+00 : f32
    %174 = vector.broadcast %cst_116 : f32 to vector<2x10xf32>
    %175 = arith.addf %173, %174 : vector<2x10xf32>
    %cst_117 = arith.constant 5.000000e-01 : f32
    %176 = vector.broadcast %cst_117 : f32 to vector<2x10xf32>
    %177 = arith.mulf %176, %175 : vector<2x10xf32>
    %178 = arith.mulf %169, %141 : vector<2x10xf32>
    %179 = arith.mulf %162, %170 : vector<2x10xf32>
    %180 = arith.addf %178, %179 : vector<2x10xf32>
    %181 = math.tanh %180 : vector<2x10xf32>
    %182 = arith.mulf %177, %181 : vector<2x10xf32>
    %c6 = arith.constant 6 : index
    %c0_118 = arith.constant 0 : index
    %183 = vector.load %arg12[%c6, %c0_118] : memref<16x10xf32, #tpu.memory_space<vmem>>, vector<2x10xf32>
    %cst_119 = arith.constant dense<0.000000e+00> : vector<2x10xf32>
    %184 = tpu.matmul %182, %57, %cst_119 {dimension_numbers = #tpu.dot_dimension_numbers<[1], [0], [0], [1], [0, 0, 1, 1], [], []>} : vector<2x10xf32>, vector<10x10xf32>, vector<2x10xf32> -> vector<2x10xf32>
    %185 = arith.addf %183, %184 : vector<2x10xf32>
    %c6_120 = arith.constant 6 : index
    %c0_121 = arith.constant 0 : index
    %186 = vector.load %arg13[%c6_120, %c0_121] : memref<16x10xf32, #tpu.memory_space<vmem>>, vector<2x10xf32>
    %cst_122 = arith.constant dense<0.000000e+00> : vector<2x10xf32>
    %187 = tpu.matmul %182, %59, %cst_122 {dimension_numbers = #tpu.dot_dimension_numbers<[1], [0], [0], [1], [0, 0, 1, 1], [], []>} : vector<2x10xf32>, vector<10x10xf32>, vector<2x10xf32> -> vector<2x10xf32>
    %188 = arith.addf %186, %187 : vector<2x10xf32>
    %c6_123 = arith.constant 6 : index
    %c0_124 = arith.constant 0 : index
    %189 = vector.load %arg14[%c6_123, %c0_124] : memref<16x10xf32, #tpu.memory_space<vmem>>, vector<2x10xf32>
    %cst_125 = arith.constant dense<0.000000e+00> : vector<2x10xf32>
    %190 = tpu.matmul %182, %61, %cst_125 {dimension_numbers = #tpu.dot_dimension_numbers<[1], [0], [0], [1], [0, 0, 1, 1], [], []>} : vector<2x10xf32>, vector<10x10xf32>, vector<2x10xf32> -> vector<2x10xf32>
    %191 = arith.addf %189, %190 : vector<2x10xf32>
    %c6_126 = arith.constant 6 : index
    %c0_127 = arith.constant 0 : index
    %192 = vector.load %arg15[%c6_126, %c0_127] : memref<16x10xf32, #tpu.memory_space<vmem>>, vector<2x10xf32>
    %cst_128 = arith.constant dense<0.000000e+00> : vector<2x10xf32>
    %193 = tpu.matmul %182, %63, %cst_128 {dimension_numbers = #tpu.dot_dimension_numbers<[1], [0], [0], [1], [0, 0, 1, 1], [], []>} : vector<2x10xf32>, vector<10x10xf32>, vector<2x10xf32> -> vector<2x10xf32>
    %194 = arith.addf %192, %193 : vector<2x10xf32>
    %cst_129 = arith.constant 5.000000e-01 : f32
    %195 = vector.broadcast %cst_129 : f32 to vector<2x10xf32>
    %196 = arith.mulf %195, %185 : vector<2x10xf32>
    %197 = math.tanh %196 : vector<2x10xf32>
    %cst_130 = arith.constant 1.000000e+00 : f32
    %198 = vector.broadcast %cst_130 : f32 to vector<2x10xf32>
    %199 = arith.addf %197, %198 : vector<2x10xf32>
    %cst_131 = arith.constant 5.000000e-01 : f32
    %200 = vector.broadcast %cst_131 : f32 to vector<2x10xf32>
    %201 = arith.mulf %200, %199 : vector<2x10xf32>
    %cst_132 = arith.constant 5.000000e-01 : f32
    %202 = vector.broadcast %cst_132 : f32 to vector<2x10xf32>
    %203 = arith.mulf %202, %188 : vector<2x10xf32>
    %204 = math.tanh %203 : vector<2x10xf32>
    %cst_133 = arith.constant 1.000000e+00 : f32
    %205 = vector.broadcast %cst_133 : f32 to vector<2x10xf32>
    %206 = arith.addf %204, %205 : vector<2x10xf32>
    %cst_134 = arith.constant 5.000000e-01 : f32
    %207 = vector.broadcast %cst_134 : f32 to vector<2x10xf32>
    %208 = arith.mulf %207, %206 : vector<2x10xf32>
    %209 = math.tanh %191 : vector<2x10xf32>
    %cst_135 = arith.constant 5.000000e-01 : f32
    %210 = vector.broadcast %cst_135 : f32 to vector<2x10xf32>
    %211 = arith.mulf %210, %194 : vector<2x10xf32>
    %212 = math.tanh %211 : vector<2x10xf32>
    %cst_136 = arith.constant 1.000000e+00 : f32
    %213 = vector.broadcast %cst_136 : f32 to vector<2x10xf32>
    %214 = arith.addf %212, %213 : vector<2x10xf32>
    %cst_137 = arith.constant 5.000000e-01 : f32
    %215 = vector.broadcast %cst_137 : f32 to vector<2x10xf32>
    %216 = arith.mulf %215, %214 : vector<2x10xf32>
    %217 = arith.mulf %208, %180 : vector<2x10xf32>
    %218 = arith.mulf %201, %209 : vector<2x10xf32>
    %219 = arith.addf %217, %218 : vector<2x10xf32>
    %220 = math.tanh %219 : vector<2x10xf32>
    %221 = arith.mulf %216, %220 : vector<2x10xf32>
    %c8 = arith.constant 8 : index
    %c0_138 = arith.constant 0 : index
    %222 = vector.load %arg12[%c8, %c0_138] : memref<16x10xf32, #tpu.memory_space<vmem>>, vector<2x10xf32>
    %cst_139 = arith.constant dense<0.000000e+00> : vector<2x10xf32>
    %223 = tpu.matmul %221, %57, %cst_139 {dimension_numbers = #tpu.dot_dimension_numbers<[1], [0], [0], [1], [0, 0, 1, 1], [], []>} : vector<2x10xf32>, vector<10x10xf32>, vector<2x10xf32> -> vector<2x10xf32>
    %224 = arith.addf %222, %223 : vector<2x10xf32>
    %c8_140 = arith.constant 8 : index
    %c0_141 = arith.constant 0 : index
    %225 = vector.load %arg13[%c8_140, %c0_141] : memref<16x10xf32, #tpu.memory_space<vmem>>, vector<2x10xf32>
    %cst_142 = arith.constant dense<0.000000e+00> : vector<2x10xf32>
    %226 = tpu.matmul %221, %59, %cst_142 {dimension_numbers = #tpu.dot_dimension_numbers<[1], [0], [0], [1], [0, 0, 1, 1], [], []>} : vector<2x10xf32>, vector<10x10xf32>, vector<2x10xf32> -> vector<2x10xf32>
    %227 = arith.addf %225, %226 : vector<2x10xf32>
    %c8_143 = arith.constant 8 : index
    %c0_144 = arith.constant 0 : index
    %228 = vector.load %arg14[%c8_143, %c0_144] : memref<16x10xf32, #tpu.memory_space<vmem>>, vector<2x10xf32>
    %cst_145 = arith.constant dense<0.000000e+00> : vector<2x10xf32>
    %229 = tpu.matmul %221, %61, %cst_145 {dimension_numbers = #tpu.dot_dimension_numbers<[1], [0], [0], [1], [0, 0, 1, 1], [], []>} : vector<2x10xf32>, vector<10x10xf32>, vector<2x10xf32> -> vector<2x10xf32>
    %230 = arith.addf %228, %229 : vector<2x10xf32>
    %c8_146 = arith.constant 8 : index
    %c0_147 = arith.constant 0 : index
    %231 = vector.load %arg15[%c8_146, %c0_147] : memref<16x10xf32, #tpu.memory_space<vmem>>, vector<2x10xf32>
    %cst_148 = arith.constant dense<0.000000e+00> : vector<2x10xf32>
    %232 = tpu.matmul %221, %63, %cst_148 {dimension_numbers = #tpu.dot_dimension_numbers<[1], [0], [0], [1], [0, 0, 1, 1], [], []>} : vector<2x10xf32>, vector<10x10xf32>, vector<2x10xf32> -> vector<2x10xf32>
    %233 = arith.addf %231, %232 : vector<2x10xf32>
    %cst_149 = arith.constant 5.000000e-01 : f32
    %234 = vector.broadcast %cst_149 : f32 to vector<2x10xf32>
    %235 = arith.mulf %234, %224 : vector<2x10xf32>
    %236 = math.tanh %235 : vector<2x10xf32>
    %cst_150 = arith.constant 1.000000e+00 : f32
    %237 = vector.broadcast %cst_150 : f32 to vector<2x10xf32>
    %238 = arith.addf %236, %237 : vector<2x10xf32>
    %cst_151 = arith.constant 5.000000e-01 : f32
    %239 = vector.broadcast %cst_151 : f32 to vector<2x10xf32>
    %240 = arith.mulf %239, %238 : vector<2x10xf32>
    %cst_152 = arith.constant 5.000000e-01 : f32
    %241 = vector.broadcast %cst_152 : f32 to vector<2x10xf32>
    %242 = arith.mulf %241, %227 : vector<2x10xf32>
    %243 = math.tanh %242 : vector<2x10xf32>
    %cst_153 = arith.constant 1.000000e+00 : f32
    %244 = vector.broadcast %cst_153 : f32 to vector<2x10xf32>
    %245 = arith.addf %243, %244 : vector<2x10xf32>
    %cst_154 = arith.constant 5.000000e-01 : f32
    %246 = vector.broadcast %cst_154 : f32 to vector<2x10xf32>
    %247 = arith.mulf %246, %245 : vector<2x10xf32>
    %248 = math.tanh %230 : vector<2x10xf32>
    %cst_155 = arith.constant 5.000000e-01 : f32
    %249 = vector.broadcast %cst_155 : f32 to vector<2x10xf32>
    %250 = arith.mulf %249, %233 : vector<2x10xf32>
    %251 = math.tanh %250 : vector<2x10xf32>
    %cst_156 = arith.constant 1.000000e+00 : f32
    %252 = vector.broadcast %cst_156 : f32 to vector<2x10xf32>
    %253 = arith.addf %251, %252 : vector<2x10xf32>
    %cst_157 = arith.constant 5.000000e-01 : f32
    %254 = vector.broadcast %cst_157 : f32 to vector<2x10xf32>
    %255 = arith.mulf %254, %253 : vector<2x10xf32>
    %256 = arith.mulf %247, %219 : vector<2x10xf32>
    %257 = arith.mulf %240, %248 : vector<2x10xf32>
    %258 = arith.addf %256, %257 : vector<2x10xf32>
    %259 = math.tanh %258 : vector<2x10xf32>
    %260 = arith.mulf %255, %259 : vector<2x10xf32>
    %c10 = arith.constant 10 : index
    %c0_158 = arith.constant 0 : index
    %261 = vector.load %arg12[%c10, %c0_158] : memref<16x10xf32, #tpu.memory_space<vmem>>, vector<2x10xf32>
    %cst_159 = arith.constant dense<0.000000e+00> : vector<2x10xf32>
    %262 = tpu.matmul %260, %57, %cst_159 {dimension_numbers = #tpu.dot_dimension_numbers<[1], [0], [0], [1], [0, 0, 1, 1], [], []>} : vector<2x10xf32>, vector<10x10xf32>, vector<2x10xf32> -> vector<2x10xf32>
    %263 = arith.addf %261, %262 : vector<2x10xf32>
    %c10_160 = arith.constant 10 : index
    %c0_161 = arith.constant 0 : index
    %264 = vector.load %arg13[%c10_160, %c0_161] : memref<16x10xf32, #tpu.memory_space<vmem>>, vector<2x10xf32>
    %cst_162 = arith.constant dense<0.000000e+00> : vector<2x10xf32>
    %265 = tpu.matmul %260, %59, %cst_162 {dimension_numbers = #tpu.dot_dimension_numbers<[1], [0], [0], [1], [0, 0, 1, 1], [], []>} : vector<2x10xf32>, vector<10x10xf32>, vector<2x10xf32> -> vector<2x10xf32>
    %266 = arith.addf %264, %265 : vector<2x10xf32>
    %c10_163 = arith.constant 10 : index
    %c0_164 = arith.constant 0 : index
    %267 = vector.load %arg14[%c10_163, %c0_164] : memref<16x10xf32, #tpu.memory_space<vmem>>, vector<2x10xf32>
    %cst_165 = arith.constant dense<0.000000e+00> : vector<2x10xf32>
    %268 = tpu.matmul %260, %61, %cst_165 {dimension_numbers = #tpu.dot_dimension_numbers<[1], [0], [0], [1], [0, 0, 1, 1], [], []>} : vector<2x10xf32>, vector<10x10xf32>, vector<2x10xf32> -> vector<2x10xf32>
    %269 = arith.addf %267, %268 : vector<2x10xf32>
    %c10_166 = arith.constant 10 : index
    %c0_167 = arith.constant 0 : index
    %270 = vector.load %arg15[%c10_166, %c0_167] : memref<16x10xf32, #tpu.memory_space<vmem>>, vector<2x10xf32>
    %cst_168 = arith.constant dense<0.000000e+00> : vector<2x10xf32>
    %271 = tpu.matmul %260, %63, %cst_168 {dimension_numbers = #tpu.dot_dimension_numbers<[1], [0], [0], [1], [0, 0, 1, 1], [], []>} : vector<2x10xf32>, vector<10x10xf32>, vector<2x10xf32> -> vector<2x10xf32>
    %272 = arith.addf %270, %271 : vector<2x10xf32>
    %cst_169 = arith.constant 5.000000e-01 : f32
    %273 = vector.broadcast %cst_169 : f32 to vector<2x10xf32>
    %274 = arith.mulf %273, %263 : vector<2x10xf32>
    %275 = math.tanh %274 : vector<2x10xf32>
    %cst_170 = arith.constant 1.000000e+00 : f32
    %276 = vector.broadcast %cst_170 : f32 to vector<2x10xf32>
    %277 = arith.addf %275, %276 : vector<2x10xf32>
    %cst_171 = arith.constant 5.000000e-01 : f32
    %278 = vector.broadcast %cst_171 : f32 to vector<2x10xf32>
    %279 = arith.mulf %278, %277 : vector<2x10xf32>
    %cst_172 = arith.constant 5.000000e-01 : f32
    %280 = vector.broadcast %cst_172 : f32 to vector<2x10xf32>
    %281 = arith.mulf %280, %266 : vector<2x10xf32>
    %282 = math.tanh %281 : vector<2x10xf32>
    %cst_173 = arith.constant 1.000000e+00 : f32
    %283 = vector.broadcast %cst_173 : f32 to vector<2x10xf32>
    %284 = arith.addf %282, %283 : vector<2x10xf32>
    %cst_174 = arith.constant 5.000000e-01 : f32
    %285 = vector.broadcast %cst_174 : f32 to vector<2x10xf32>
    %286 = arith.mulf %285, %284 : vector<2x10xf32>
    %287 = math.tanh %269 : vector<2x10xf32>
    %cst_175 = arith.constant 5.000000e-01 : f32
    %288 = vector.broadcast %cst_175 : f32 to vector<2x10xf32>
    %289 = arith.mulf %288, %272 : vector<2x10xf32>
    %290 = math.tanh %289 : vector<2x10xf32>
    %cst_176 = arith.constant 1.000000e+00 : f32
    %291 = vector.broadcast %cst_176 : f32 to vector<2x10xf32>
    %292 = arith.addf %290, %291 : vector<2x10xf32>
    %cst_177 = arith.constant 5.000000e-01 : f32
    %293 = vector.broadcast %cst_177 : f32 to vector<2x10xf32>
    %294 = arith.mulf %293, %292 : vector<2x10xf32>
    %295 = arith.mulf %286, %258 : vector<2x10xf32>
    %296 = arith.mulf %279, %287 : vector<2x10xf32>
    %297 = arith.addf %295, %296 : vector<2x10xf32>
    %298 = math.tanh %297 : vector<2x10xf32>
    %299 = arith.mulf %294, %298 : vector<2x10xf32>
    %c12 = arith.constant 12 : index
    %c0_178 = arith.constant 0 : index
    %300 = vector.load %arg12[%c12, %c0_178] : memref<16x10xf32, #tpu.memory_space<vmem>>, vector<2x10xf32>
    %cst_179 = arith.constant dense<0.000000e+00> : vector<2x10xf32>
    %301 = tpu.matmul %299, %57, %cst_179 {dimension_numbers = #tpu.dot_dimension_numbers<[1], [0], [0], [1], [0, 0, 1, 1], [], []>} : vector<2x10xf32>, vector<10x10xf32>, vector<2x10xf32> -> vector<2x10xf32>
    %302 = arith.addf %300, %301 : vector<2x10xf32>
    %c12_180 = arith.constant 12 : index
    %c0_181 = arith.constant 0 : index
    %303 = vector.load %arg13[%c12_180, %c0_181] : memref<16x10xf32, #tpu.memory_space<vmem>>, vector<2x10xf32>
    %cst_182 = arith.constant dense<0.000000e+00> : vector<2x10xf32>
    %304 = tpu.matmul %299, %59, %cst_182 {dimension_numbers = #tpu.dot_dimension_numbers<[1], [0], [0], [1], [0, 0, 1, 1], [], []>} : vector<2x10xf32>, vector<10x10xf32>, vector<2x10xf32> -> vector<2x10xf32>
    %305 = arith.addf %303, %304 : vector<2x10xf32>
    %c12_183 = arith.constant 12 : index
    %c0_184 = arith.constant 0 : index
    %306 = vector.load %arg14[%c12_183, %c0_184] : memref<16x10xf32, #tpu.memory_space<vmem>>, vector<2x10xf32>
    %cst_185 = arith.constant dense<0.000000e+00> : vector<2x10xf32>
    %307 = tpu.matmul %299, %61, %cst_185 {dimension_numbers = #tpu.dot_dimension_numbers<[1], [0], [0], [1], [0, 0, 1, 1], [], []>} : vector<2x10xf32>, vector<10x10xf32>, vector<2x10xf32> -> vector<2x10xf32>
    %308 = arith.addf %306, %307 : vector<2x10xf32>
    %c12_186 = arith.constant 12 : index
    %c0_187 = arith.constant 0 : index
    %309 = vector.load %arg15[%c12_186, %c0_187] : memref<16x10xf32, #tpu.memory_space<vmem>>, vector<2x10xf32>
    %cst_188 = arith.constant dense<0.000000e+00> : vector<2x10xf32>
    %310 = tpu.matmul %299, %63, %cst_188 {dimension_numbers = #tpu.dot_dimension_numbers<[1], [0], [0], [1], [0, 0, 1, 1], [], []>} : vector<2x10xf32>, vector<10x10xf32>, vector<2x10xf32> -> vector<2x10xf32>
    %311 = arith.addf %309, %310 : vector<2x10xf32>
    %cst_189 = arith.constant 5.000000e-01 : f32
    %312 = vector.broadcast %cst_189 : f32 to vector<2x10xf32>
    %313 = arith.mulf %312, %302 : vector<2x10xf32>
    %314 = math.tanh %313 : vector<2x10xf32>
    %cst_190 = arith.constant 1.000000e+00 : f32
    %315 = vector.broadcast %cst_190 : f32 to vector<2x10xf32>
    %316 = arith.addf %314, %315 : vector<2x10xf32>
    %cst_191 = arith.constant 5.000000e-01 : f32
    %317 = vector.broadcast %cst_191 : f32 to vector<2x10xf32>
    %318 = arith.mulf %317, %316 : vector<2x10xf32>
    %cst_192 = arith.constant 5.000000e-01 : f32
    %319 = vector.broadcast %cst_192 : f32 to vector<2x10xf32>
    %320 = arith.mulf %319, %305 : vector<2x10xf32>
    %321 = math.tanh %320 : vector<2x10xf32>
    %cst_193 = arith.constant 1.000000e+00 : f32
    %322 = vector.broadcast %cst_193 : f32 to vector<2x10xf32>
    %323 = arith.addf %321, %322 : vector<2x10xf32>
    %cst_194 = arith.constant 5.000000e-01 : f32
    %324 = vector.broadcast %cst_194 : f32 to vector<2x10xf32>
    %325 = arith.mulf %324, %323 : vector<2x10xf32>
    %326 = math.tanh %308 : vector<2x10xf32>
    %cst_195 = arith.constant 5.000000e-01 : f32
    %327 = vector.broadcast %cst_195 : f32 to vector<2x10xf32>
    %328 = arith.mulf %327, %311 : vector<2x10xf32>
    %329 = math.tanh %328 : vector<2x10xf32>
    %cst_196 = arith.constant 1.000000e+00 : f32
    %330 = vector.broadcast %cst_196 : f32 to vector<2x10xf32>
    %331 = arith.addf %329, %330 : vector<2x10xf32>
    %cst_197 = arith.constant 5.000000e-01 : f32
    %332 = vector.broadcast %cst_197 : f32 to vector<2x10xf32>
    %333 = arith.mulf %332, %331 : vector<2x10xf32>
    %334 = arith.mulf %325, %297 : vector<2x10xf32>
    %335 = arith.mulf %318, %326 : vector<2x10xf32>
    %336 = arith.addf %334, %335 : vector<2x10xf32>
    %337 = math.tanh %336 : vector<2x10xf32>
    %338 = arith.mulf %333, %337 : vector<2x10xf32>
    %c14 = arith.constant 14 : index
    %c0_198 = arith.constant 0 : index
    %339 = vector.load %arg12[%c14, %c0_198] : memref<16x10xf32, #tpu.memory_space<vmem>>, vector<2x10xf32>
    %cst_199 = arith.constant dense<0.000000e+00> : vector<2x10xf32>
    %340 = tpu.matmul %338, %57, %cst_199 {dimension_numbers = #tpu.dot_dimension_numbers<[1], [0], [0], [1], [0, 0, 1, 1], [], []>} : vector<2x10xf32>, vector<10x10xf32>, vector<2x10xf32> -> vector<2x10xf32>
    %341 = arith.addf %339, %340 : vector<2x10xf32>
    %c14_200 = arith.constant 14 : index
    %c0_201 = arith.constant 0 : index
    %342 = vector.load %arg13[%c14_200, %c0_201] : memref<16x10xf32, #tpu.memory_space<vmem>>, vector<2x10xf32>
    %cst_202 = arith.constant dense<0.000000e+00> : vector<2x10xf32>
    %343 = tpu.matmul %338, %59, %cst_202 {dimension_numbers = #tpu.dot_dimension_numbers<[1], [0], [0], [1], [0, 0, 1, 1], [], []>} : vector<2x10xf32>, vector<10x10xf32>, vector<2x10xf32> -> vector<2x10xf32>
    %344 = arith.addf %342, %343 : vector<2x10xf32>
    %c14_203 = arith.constant 14 : index
    %c0_204 = arith.constant 0 : index
    %345 = vector.load %arg14[%c14_203, %c0_204] : memref<16x10xf32, #tpu.memory_space<vmem>>, vector<2x10xf32>
    %cst_205 = arith.constant dense<0.000000e+00> : vector<2x10xf32>
    %346 = tpu.matmul %338, %61, %cst_205 {dimension_numbers = #tpu.dot_dimension_numbers<[1], [0], [0], [1], [0, 0, 1, 1], [], []>} : vector<2x10xf32>, vector<10x10xf32>, vector<2x10xf32> -> vector<2x10xf32>
    %347 = arith.addf %345, %346 : vector<2x10xf32>
    %c14_206 = arith.constant 14 : index
    %c0_207 = arith.constant 0 : index
    %348 = vector.load %arg15[%c14_206, %c0_207] : memref<16x10xf32, #tpu.memory_space<vmem>>, vector<2x10xf32>
    %cst_208 = arith.constant dense<0.000000e+00> : vector<2x10xf32>
    %349 = tpu.matmul %338, %63, %cst_208 {dimension_numbers = #tpu.dot_dimension_numbers<[1], [0], [0], [1], [0, 0, 1, 1], [], []>} : vector<2x10xf32>, vector<10x10xf32>, vector<2x10xf32> -> vector<2x10xf32>
    %350 = arith.addf %348, %349 : vector<2x10xf32>
    %cst_209 = arith.constant 5.000000e-01 : f32
    %351 = vector.broadcast %cst_209 : f32 to vector<2x10xf32>
    %352 = arith.mulf %351, %341 : vector<2x10xf32>
    %353 = math.tanh %352 : vector<2x10xf32>
    %cst_210 = arith.constant 1.000000e+00 : f32
    %354 = vector.broadcast %cst_210 : f32 to vector<2x10xf32>
    %355 = arith.addf %353, %354 : vector<2x10xf32>
    %cst_211 = arith.constant 5.000000e-01 : f32
    %356 = vector.broadcast %cst_211 : f32 to vector<2x10xf32>
    %357 = arith.mulf %356, %355 : vector<2x10xf32>
    %cst_212 = arith.constant 5.000000e-01 : f32
    %358 = vector.broadcast %cst_212 : f32 to vector<2x10xf32>
    %359 = arith.mulf %358, %344 : vector<2x10xf32>
    %360 = math.tanh %359 : vector<2x10xf32>
    %cst_213 = arith.constant 1.000000e+00 : f32
    %361 = vector.broadcast %cst_213 : f32 to vector<2x10xf32>
    %362 = arith.addf %360, %361 : vector<2x10xf32>
    %cst_214 = arith.constant 5.000000e-01 : f32
    %363 = vector.broadcast %cst_214 : f32 to vector<2x10xf32>
    %364 = arith.mulf %363, %362 : vector<2x10xf32>
    %365 = math.tanh %347 : vector<2x10xf32>
    %cst_215 = arith.constant 5.000000e-01 : f32
    %366 = vector.broadcast %cst_215 : f32 to vector<2x10xf32>
    %367 = arith.mulf %366, %350 : vector<2x10xf32>
    %368 = math.tanh %367 : vector<2x10xf32>
    %cst_216 = arith.constant 1.000000e+00 : f32
    %369 = vector.broadcast %cst_216 : f32 to vector<2x10xf32>
    %370 = arith.addf %368, %369 : vector<2x10xf32>
    %cst_217 = arith.constant 5.000000e-01 : f32
    %371 = vector.broadcast %cst_217 : f32 to vector<2x10xf32>
    %372 = arith.mulf %371, %370 : vector<2x10xf32>
    %373 = arith.mulf %364, %336 : vector<2x10xf32>
    %374 = arith.mulf %357, %365 : vector<2x10xf32>
    %375 = arith.addf %373, %374 : vector<2x10xf32>
    %376 = math.tanh %375 : vector<2x10xf32>
    %377 = arith.mulf %372, %376 : vector<2x10xf32>
    %c0_218 = arith.constant 0 : index
    %c0_219 = arith.constant 0 : index
    %378 = vector.load %arg5[%c0_218, %c0_219] : memref<10x10xf32, #tpu.memory_space<vmem>>, vector<10x10xf32>
    %cst_220 = arith.constant dense<0.000000e+00> : vector<2x10xf32>
    %379 = tpu.matmul %377, %378, %cst_220 {dimension_numbers = #tpu.dot_dimension_numbers<[1], [0], [0], [1], [0, 0, 1, 1], [], []>} : vector<2x10xf32>, vector<10x10xf32>, vector<2x10xf32> -> vector<2x10xf32>
    %c0_221 = arith.constant 0 : index
    %c0_222 = arith.constant 0 : index
    %380 = vector.load %arg6[%c0_221, %c0_222] : memref<1x10xf32, #tpu.memory_space<vmem>>, vector<1x10xf32>
    %381 = vector.broadcast %380 : vector<1x10xf32> to vector<2x10xf32>
    %382 = arith.addf %379, %381 : vector<2x10xf32>
    %c0_223 = arith.constant 0 : index
    %c0_224 = arith.constant 0 : index
    %c0_225 = arith.constant 0 : index
    %383 = vector.load %arg7[%c0_223, %c0_224, %c0_225] : memref<4x10x10xf32, #tpu.memory_space<vmem>>, vector<1x10x10xf32>
    %384 = vector.shape_cast %383 : vector<1x10x10xf32> to vector<10x10xf32>
    %c1_226 = arith.constant 1 : index
    %c0_227 = arith.constant 0 : index
    %c0_228 = arith.constant 0 : index
    %385 = vector.load %arg7[%c1_226, %c0_227, %c0_228] : memref<4x10x10xf32, #tpu.memory_space<vmem>>, vector<1x10x10xf32>
    %386 = vector.shape_cast %385 : vector<1x10x10xf32> to vector<10x10xf32>
    %c2_229 = arith.constant 2 : index
    %c0_230 = arith.constant 0 : index
    %c0_231 = arith.constant 0 : index
    %387 = vector.load %arg7[%c2_229, %c0_230, %c0_231] : memref<4x10x10xf32, #tpu.memory_space<vmem>>, vector<1x10x10xf32>
    %388 = vector.shape_cast %387 : vector<1x10x10xf32> to vector<10x10xf32>
    %c3_232 = arith.constant 3 : index
    %c0_233 = arith.constant 0 : index
    %c0_234 = arith.constant 0 : index
    %389 = vector.load %arg7[%c3_232, %c0_233, %c0_234] : memref<4x10x10xf32, #tpu.memory_space<vmem>>, vector<1x10x10xf32>
    %390 = vector.shape_cast %389 : vector<1x10x10xf32> to vector<10x10xf32>
    %c0_235 = arith.constant 0 : index
    %c0_236 = arith.constant 0 : index
    %c0_237 = arith.constant 0 : index
    %391 = vector.load %arg8[%c0_235, %c0_236, %c0_237] : memref<4x1x10xf32, #tpu.memory_space<vmem>>, vector<1x1x10xf32>
    %392 = vector.shape_cast %391 : vector<1x1x10xf32> to vector<1x10xf32>
    %c1_238 = arith.constant 1 : index
    %c0_239 = arith.constant 0 : index
    %c0_240 = arith.constant 0 : index
    %393 = vector.load %arg8[%c1_238, %c0_239, %c0_240] : memref<4x1x10xf32, #tpu.memory_space<vmem>>, vector<1x1x10xf32>
    %394 = vector.shape_cast %393 : vector<1x1x10xf32> to vector<1x10xf32>
    %c2_241 = arith.constant 2 : index
    %c0_242 = arith.constant 0 : index
    %c0_243 = arith.constant 0 : index
    %395 = vector.load %arg8[%c2_241, %c0_242, %c0_243] : memref<4x1x10xf32, #tpu.memory_space<vmem>>, vector<1x1x10xf32>
    %396 = vector.shape_cast %395 : vector<1x1x10xf32> to vector<1x10xf32>
    %c3_244 = arith.constant 3 : index
    %c0_245 = arith.constant 0 : index
    %c0_246 = arith.constant 0 : index
    %397 = vector.load %arg8[%c3_244, %c0_245, %c0_246] : memref<4x1x10xf32, #tpu.memory_space<vmem>>, vector<1x1x10xf32>
    %398 = vector.shape_cast %397 : vector<1x1x10xf32> to vector<1x10xf32>
    %cst_247 = arith.constant 1.000000e+00 : f32
    %399 = vector.broadcast %cst_247 : f32 to vector<2x10xf32>
    %cst_248 = arith.constant dense<0.000000e+00> : vector<2x10xf32>
    %400 = tpu.matmul %382, %384, %cst_248 {dimension_numbers = #tpu.dot_dimension_numbers<[1], [0], [0], [1], [0, 0, 1, 1], [], []>} : vector<2x10xf32>, vector<10x10xf32>, vector<2x10xf32> -> vector<2x10xf32>
    %401 = vector.broadcast %392 : vector<1x10xf32> to vector<2x10xf32>
    %402 = arith.addf %400, %401 : vector<2x10xf32>
    %cst_249 = arith.constant dense<0.000000e+00> : vector<2x10xf32>
    %403 = tpu.matmul %382, %386, %cst_249 {dimension_numbers = #tpu.dot_dimension_numbers<[1], [0], [0], [1], [0, 0, 1, 1], [], []>} : vector<2x10xf32>, vector<10x10xf32>, vector<2x10xf32> -> vector<2x10xf32>
    %404 = vector.broadcast %394 : vector<1x10xf32> to vector<2x10xf32>
    %405 = arith.addf %403, %404 : vector<2x10xf32>
    %cst_250 = arith.constant dense<0.000000e+00> : vector<2x10xf32>
    %406 = tpu.matmul %382, %388, %cst_250 {dimension_numbers = #tpu.dot_dimension_numbers<[1], [0], [0], [1], [0, 0, 1, 1], [], []>} : vector<2x10xf32>, vector<10x10xf32>, vector<2x10xf32> -> vector<2x10xf32>
    %407 = vector.broadcast %396 : vector<1x10xf32> to vector<2x10xf32>
    %408 = arith.addf %406, %407 : vector<2x10xf32>
    %cst_251 = arith.constant dense<0.000000e+00> : vector<2x10xf32>
    %409 = tpu.matmul %382, %390, %cst_251 {dimension_numbers = #tpu.dot_dimension_numbers<[1], [0], [0], [1], [0, 0, 1, 1], [], []>} : vector<2x10xf32>, vector<10x10xf32>, vector<2x10xf32> -> vector<2x10xf32>
    %410 = vector.broadcast %398 : vector<1x10xf32> to vector<2x10xf32>
    %411 = arith.addf %409, %410 : vector<2x10xf32>
    %cst_252 = arith.constant 5.000000e-01 : f32
    %412 = vector.broadcast %cst_252 : f32 to vector<2x10xf32>
    %413 = arith.mulf %412, %402 : vector<2x10xf32>
    %414 = math.tanh %413 : vector<2x10xf32>
    %cst_253 = arith.constant 1.000000e+00 : f32
    %415 = vector.broadcast %cst_253 : f32 to vector<2x10xf32>
    %416 = arith.addf %414, %415 : vector<2x10xf32>
    %cst_254 = arith.constant 5.000000e-01 : f32
    %417 = vector.broadcast %cst_254 : f32 to vector<2x10xf32>
    %418 = arith.mulf %417, %416 : vector<2x10xf32>
    %cst_255 = arith.constant 5.000000e-01 : f32
    %419 = vector.broadcast %cst_255 : f32 to vector<2x10xf32>
    %420 = arith.mulf %419, %405 : vector<2x10xf32>
    %421 = math.tanh %420 : vector<2x10xf32>
    %cst_256 = arith.constant 1.000000e+00 : f32
    %422 = vector.broadcast %cst_256 : f32 to vector<2x10xf32>
    %423 = arith.addf %421, %422 : vector<2x10xf32>
    %cst_257 = arith.constant 5.000000e-01 : f32
    %424 = vector.broadcast %cst_257 : f32 to vector<2x10xf32>
    %425 = arith.mulf %424, %423 : vector<2x10xf32>
    %426 = math.tanh %408 : vector<2x10xf32>
    %cst_258 = arith.constant 5.000000e-01 : f32
    %427 = vector.broadcast %cst_258 : f32 to vector<2x10xf32>
    %428 = arith.mulf %427, %411 : vector<2x10xf32>
    %429 = math.tanh %428 : vector<2x10xf32>
    %cst_259 = arith.constant 1.000000e+00 : f32
    %430 = vector.broadcast %cst_259 : f32 to vector<2x10xf32>
    %431 = arith.addf %429, %430 : vector<2x10xf32>
    %cst_260 = arith.constant 5.000000e-01 : f32
    %432 = vector.broadcast %cst_260 : f32 to vector<2x10xf32>
    %433 = arith.mulf %432, %431 : vector<2x10xf32>
    %434 = arith.mulf %425, %399 : vector<2x10xf32>
    %435 = arith.mulf %418, %426 : vector<2x10xf32>
    %436 = arith.addf %434, %435 : vector<2x10xf32>
    %437 = math.tanh %436 : vector<2x10xf32>
    %438 = arith.mulf %433, %437 : vector<2x10xf32>
    %c0_261 = arith.constant 0 : index
    %c0_262 = arith.constant 0 : index
    %439 = vector.load %arg16[%c0_261, %c0_262] : memref<16x10xf32, #tpu.memory_space<vmem>>, vector<2x10xf32>
    tpu.vector_store %arg16[%c0_261, %c0_262], %438 {strides = array<i32>} : memref<16x10xf32, #tpu.memory_space<vmem>>, vector<2x10xf32>,
    %cst_263 = arith.constant dense<0.000000e+00> : vector<2x10xf32>
    %440 = tpu.matmul %438, %384, %cst_263 {dimension_numbers = #tpu.dot_dimension_numbers<[1], [0], [0], [1], [0, 0, 1, 1], [], []>} : vector<2x10xf32>, vector<10x10xf32>, vector<2x10xf32> -> vector<2x10xf32>
    %441 = vector.broadcast %392 : vector<1x10xf32> to vector<2x10xf32>
    %442 = arith.addf %440, %441 : vector<2x10xf32>
    %cst_264 = arith.constant dense<0.000000e+00> : vector<2x10xf32>
    %443 = tpu.matmul %438, %386, %cst_264 {dimension_numbers = #tpu.dot_dimension_numbers<[1], [0], [0], [1], [0, 0, 1, 1], [], []>} : vector<2x10xf32>, vector<10x10xf32>, vector<2x10xf32> -> vector<2x10xf32>
    %444 = vector.broadcast %394 : vector<1x10xf32> to vector<2x10xf32>
    %445 = arith.addf %443, %444 : vector<2x10xf32>
    %cst_265 = arith.constant dense<0.000000e+00> : vector<2x10xf32>
    %446 = tpu.matmul %438, %388, %cst_265 {dimension_numbers = #tpu.dot_dimension_numbers<[1], [0], [0], [1], [0, 0, 1, 1], [], []>} : vector<2x10xf32>, vector<10x10xf32>, vector<2x10xf32> -> vector<2x10xf32>
    %447 = vector.broadcast %396 : vector<1x10xf32> to vector<2x10xf32>
    %448 = arith.addf %446, %447 : vector<2x10xf32>
    %cst_266 = arith.constant dense<0.000000e+00> : vector<2x10xf32>
    %449 = tpu.matmul %438, %390, %cst_266 {dimension_numbers = #tpu.dot_dimension_numbers<[1], [0], [0], [1], [0, 0, 1, 1], [], []>} : vector<2x10xf32>, vector<10x10xf32>, vector<2x10xf32> -> vector<2x10xf32>
    %450 = vector.broadcast %398 : vector<1x10xf32> to vector<2x10xf32>
    %451 = arith.addf %449, %450 : vector<2x10xf32>
    %cst_267 = arith.constant 5.000000e-01 : f32
    %452 = vector.broadcast %cst_267 : f32 to vector<2x10xf32>
    %453 = arith.mulf %452, %442 : vector<2x10xf32>
    %454 = math.tanh %453 : vector<2x10xf32>
    %cst_268 = arith.constant 1.000000e+00 : f32
    %455 = vector.broadcast %cst_268 : f32 to vector<2x10xf32>
    %456 = arith.addf %454, %455 : vector<2x10xf32>
    %cst_269 = arith.constant 5.000000e-01 : f32
    %457 = vector.broadcast %cst_269 : f32 to vector<2x10xf32>
    %458 = arith.mulf %457, %456 : vector<2x10xf32>
    %cst_270 = arith.constant 5.000000e-01 : f32
    %459 = vector.broadcast %cst_270 : f32 to vector<2x10xf32>
    %460 = arith.mulf %459, %445 : vector<2x10xf32>
    %461 = math.tanh %460 : vector<2x10xf32>
    %cst_271 = arith.constant 1.000000e+00 : f32
    %462 = vector.broadcast %cst_271 : f32 to vector<2x10xf32>
    %463 = arith.addf %461, %462 : vector<2x10xf32>
    %cst_272 = arith.constant 5.000000e-01 : f32
    %464 = vector.broadcast %cst_272 : f32 to vector<2x10xf32>
    %465 = arith.mulf %464, %463 : vector<2x10xf32>
    %466 = math.tanh %448 : vector<2x10xf32>
    %cst_273 = arith.constant 5.000000e-01 : f32
    %467 = vector.broadcast %cst_273 : f32 to vector<2x10xf32>
    %468 = arith.mulf %467, %451 : vector<2x10xf32>
    %469 = math.tanh %468 : vector<2x10xf32>
    %cst_274 = arith.constant 1.000000e+00 : f32
    %470 = vector.broadcast %cst_274 : f32 to vector<2x10xf32>
    %471 = arith.addf %469, %470 : vector<2x10xf32>
    %cst_275 = arith.constant 5.000000e-01 : f32
    %472 = vector.broadcast %cst_275 : f32 to vector<2x10xf32>
    %473 = arith.mulf %472, %471 : vector<2x10xf32>
    %474 = arith.mulf %465, %436 : vector<2x10xf32>
    %475 = arith.mulf %458, %466 : vector<2x10xf32>
    %476 = arith.addf %474, %475 : vector<2x10xf32>
    %477 = math.tanh %476 : vector<2x10xf32>
    %478 = arith.mulf %473, %477 : vector<2x10xf32>
    %c2_276 = arith.constant 2 : index
    %c0_277 = arith.constant 0 : index
    %479 = vector.load %arg16[%c2_276, %c0_277] : memref<16x10xf32, #tpu.memory_space<vmem>>, vector<2x10xf32>
    tpu.vector_store %arg16[%c2_276, %c0_277], %478 {strides = array<i32>} : memref<16x10xf32, #tpu.memory_space<vmem>>, vector<2x10xf32>,
    %cst_278 = arith.constant dense<0.000000e+00> : vector<2x10xf32>
    %480 = tpu.matmul %478, %384, %cst_278 {dimension_numbers = #tpu.dot_dimension_numbers<[1], [0], [0], [1], [0, 0, 1, 1], [], []>} : vector<2x10xf32>, vector<10x10xf32>, vector<2x10xf32> -> vector<2x10xf32>
    %481 = vector.broadcast %392 : vector<1x10xf32> to vector<2x10xf32>
    %482 = arith.addf %480, %481 : vector<2x10xf32>
    %cst_279 = arith.constant dense<0.000000e+00> : vector<2x10xf32>
    %483 = tpu.matmul %478, %386, %cst_279 {dimension_numbers = #tpu.dot_dimension_numbers<[1], [0], [0], [1], [0, 0, 1, 1], [], []>} : vector<2x10xf32>, vector<10x10xf32>, vector<2x10xf32> -> vector<2x10xf32>
    %484 = vector.broadcast %394 : vector<1x10xf32> to vector<2x10xf32>
    %485 = arith.addf %483, %484 : vector<2x10xf32>
    %cst_280 = arith.constant dense<0.000000e+00> : vector<2x10xf32>
    %486 = tpu.matmul %478, %388, %cst_280 {dimension_numbers = #tpu.dot_dimension_numbers<[1], [0], [0], [1], [0, 0, 1, 1], [], []>} : vector<2x10xf32>, vector<10x10xf32>, vector<2x10xf32> -> vector<2x10xf32>
    %487 = vector.broadcast %396 : vector<1x10xf32> to vector<2x10xf32>
    %488 = arith.addf %486, %487 : vector<2x10xf32>
    %cst_281 = arith.constant dense<0.000000e+00> : vector<2x10xf32>
    %489 = tpu.matmul %478, %390, %cst_281 {dimension_numbers = #tpu.dot_dimension_numbers<[1], [0], [0], [1], [0, 0, 1, 1], [], []>} : vector<2x10xf32>, vector<10x10xf32>, vector<2x10xf32> -> vector<2x10xf32>
    %490 = vector.broadcast %398 : vector<1x10xf32> to vector<2x10xf32>
    %491 = arith.addf %489, %490 : vector<2x10xf32>
    %cst_282 = arith.constant 5.000000e-01 : f32
    %492 = vector.broadcast %cst_282 : f32 to vector<2x10xf32>
    %493 = arith.mulf %492, %482 : vector<2x10xf32>
    %494 = math.tanh %493 : vector<2x10xf32>
    %cst_283 = arith.constant 1.000000e+00 : f32
    %495 = vector.broadcast %cst_283 : f32 to vector<2x10xf32>
    %496 = arith.addf %494, %495 : vector<2x10xf32>
    %cst_284 = arith.constant 5.000000e-01 : f32
    %497 = vector.broadcast %cst_284 : f32 to vector<2x10xf32>
    %498 = arith.mulf %497, %496 : vector<2x10xf32>
    %cst_285 = arith.constant 5.000000e-01 : f32
    %499 = vector.broadcast %cst_285 : f32 to vector<2x10xf32>
    %500 = arith.mulf %499, %485 : vector<2x10xf32>
    %501 = math.tanh %500 : vector<2x10xf32>
    %cst_286 = arith.constant 1.000000e+00 : f32
    %502 = vector.broadcast %cst_286 : f32 to vector<2x10xf32>
    %503 = arith.addf %501, %502 : vector<2x10xf32>
    %cst_287 = arith.constant 5.000000e-01 : f32
    %504 = vector.broadcast %cst_287 : f32 to vector<2x10xf32>
    %505 = arith.mulf %504, %503 : vector<2x10xf32>
    %506 = math.tanh %488 : vector<2x10xf32>
    %cst_288 = arith.constant 5.000000e-01 : f32
    %507 = vector.broadcast %cst_288 : f32 to vector<2x10xf32>
    %508 = arith.mulf %507, %491 : vector<2x10xf32>
    %509 = math.tanh %508 : vector<2x10xf32>
    %cst_289 = arith.constant 1.000000e+00 : f32
    %510 = vector.broadcast %cst_289 : f32 to vector<2x10xf32>
    %511 = arith.addf %509, %510 : vector<2x10xf32>
    %cst_290 = arith.constant 5.000000e-01 : f32
    %512 = vector.broadcast %cst_290 : f32 to vector<2x10xf32>
    %513 = arith.mulf %512, %511 : vector<2x10xf32>
    %514 = arith.mulf %505, %476 : vector<2x10xf32>
    %515 = arith.mulf %498, %506 : vector<2x10xf32>
    %516 = arith.addf %514, %515 : vector<2x10xf32>
    %517 = math.tanh %516 : vector<2x10xf32>
    %518 = arith.mulf %513, %517 : vector<2x10xf32>
    %c4_291 = arith.constant 4 : index
    %c0_292 = arith.constant 0 : index
    %519 = vector.load %arg16[%c4_291, %c0_292] : memref<16x10xf32, #tpu.memory_space<vmem>>, vector<2x10xf32>
    tpu.vector_store %arg16[%c4_291, %c0_292], %518 {strides = array<i32>} : memref<16x10xf32, #tpu.memory_space<vmem>>, vector<2x10xf32>,
    %cst_293 = arith.constant dense<0.000000e+00> : vector<2x10xf32>
    %520 = tpu.matmul %518, %384, %cst_293 {dimension_numbers = #tpu.dot_dimension_numbers<[1], [0], [0], [1], [0, 0, 1, 1], [], []>} : vector<2x10xf32>, vector<10x10xf32>, vector<2x10xf32> -> vector<2x10xf32>
    %521 = vector.broadcast %392 : vector<1x10xf32> to vector<2x10xf32>
    %522 = arith.addf %520, %521 : vector<2x10xf32>
    %cst_294 = arith.constant dense<0.000000e+00> : vector<2x10xf32>
    %523 = tpu.matmul %518, %386, %cst_294 {dimension_numbers = #tpu.dot_dimension_numbers<[1], [0], [0], [1], [0, 0, 1, 1], [], []>} : vector<2x10xf32>, vector<10x10xf32>, vector<2x10xf32> -> vector<2x10xf32>
    %524 = vector.broadcast %394 : vector<1x10xf32> to vector<2x10xf32>
    %525 = arith.addf %523, %524 : vector<2x10xf32>
    %cst_295 = arith.constant dense<0.000000e+00> : vector<2x10xf32>
    %526 = tpu.matmul %518, %388, %cst_295 {dimension_numbers = #tpu.dot_dimension_numbers<[1], [0], [0], [1], [0, 0, 1, 1], [], []>} : vector<2x10xf32>, vector<10x10xf32>, vector<2x10xf32> -> vector<2x10xf32>
    %527 = vector.broadcast %396 : vector<1x10xf32> to vector<2x10xf32>
    %528 = arith.addf %526, %527 : vector<2x10xf32>
    %cst_296 = arith.constant dense<0.000000e+00> : vector<2x10xf32>
    %529 = tpu.matmul %518, %390, %cst_296 {dimension_numbers = #tpu.dot_dimension_numbers<[1], [0], [0], [1], [0, 0, 1, 1], [], []>} : vector<2x10xf32>, vector<10x10xf32>, vector<2x10xf32> -> vector<2x10xf32>
    %530 = vector.broadcast %398 : vector<1x10xf32> to vector<2x10xf32>
    %531 = arith.addf %529, %530 : vector<2x10xf32>
    %cst_297 = arith.constant 5.000000e-01 : f32
    %532 = vector.broadcast %cst_297 : f32 to vector<2x10xf32>
    %533 = arith.mulf %532, %522 : vector<2x10xf32>
    %534 = math.tanh %533 : vector<2x10xf32>
    %cst_298 = arith.constant 1.000000e+00 : f32
    %535 = vector.broadcast %cst_298 : f32 to vector<2x10xf32>
    %536 = arith.addf %534, %535 : vector<2x10xf32>
    %cst_299 = arith.constant 5.000000e-01 : f32
    %537 = vector.broadcast %cst_299 : f32 to vector<2x10xf32>
    %538 = arith.mulf %537, %536 : vector<2x10xf32>
    %cst_300 = arith.constant 5.000000e-01 : f32
    %539 = vector.broadcast %cst_300 : f32 to vector<2x10xf32>
    %540 = arith.mulf %539, %525 : vector<2x10xf32>
    %541 = math.tanh %540 : vector<2x10xf32>
    %cst_301 = arith.constant 1.000000e+00 : f32
    %542 = vector.broadcast %cst_301 : f32 to vector<2x10xf32>
    %543 = arith.addf %541, %542 : vector<2x10xf32>
    %cst_302 = arith.constant 5.000000e-01 : f32
    %544 = vector.broadcast %cst_302 : f32 to vector<2x10xf32>
    %545 = arith.mulf %544, %543 : vector<2x10xf32>
    %546 = math.tanh %528 : vector<2x10xf32>
    %cst_303 = arith.constant 5.000000e-01 : f32
    %547 = vector.broadcast %cst_303 : f32 to vector<2x10xf32>
    %548 = arith.mulf %547, %531 : vector<2x10xf32>
    %549 = math.tanh %548 : vector<2x10xf32>
    %cst_304 = arith.constant 1.000000e+00 : f32
    %550 = vector.broadcast %cst_304 : f32 to vector<2x10xf32>
    %551 = arith.addf %549, %550 : vector<2x10xf32>
    %cst_305 = arith.constant 5.000000e-01 : f32
    %552 = vector.broadcast %cst_305 : f32 to vector<2x10xf32>
    %553 = arith.mulf %552, %551 : vector<2x10xf32>
    %554 = arith.mulf %545, %516 : vector<2x10xf32>
    %555 = arith.mulf %538, %546 : vector<2x10xf32>
    %556 = arith.addf %554, %555 : vector<2x10xf32>
    %557 = math.tanh %556 : vector<2x10xf32>
    %558 = arith.mulf %553, %557 : vector<2x10xf32>
    %c6_306 = arith.constant 6 : index
    %c0_307 = arith.constant 0 : index
    %559 = vector.load %arg16[%c6_306, %c0_307] : memref<16x10xf32, #tpu.memory_space<vmem>>, vector<2x10xf32>
    tpu.vector_store %arg16[%c6_306, %c0_307], %558 {strides = array<i32>} : memref<16x10xf32, #tpu.memory_space<vmem>>, vector<2x10xf32>,
    %cst_308 = arith.constant dense<0.000000e+00> : vector<2x10xf32>
    %560 = tpu.matmul %558, %384, %cst_308 {dimension_numbers = #tpu.dot_dimension_numbers<[1], [0], [0], [1], [0, 0, 1, 1], [], []>} : vector<2x10xf32>, vector<10x10xf32>, vector<2x10xf32> -> vector<2x10xf32>
    %561 = vector.broadcast %392 : vector<1x10xf32> to vector<2x10xf32>
    %562 = arith.addf %560, %561 : vector<2x10xf32>
    %cst_309 = arith.constant dense<0.000000e+00> : vector<2x10xf32>
    %563 = tpu.matmul %558, %386, %cst_309 {dimension_numbers = #tpu.dot_dimension_numbers<[1], [0], [0], [1], [0, 0, 1, 1], [], []>} : vector<2x10xf32>, vector<10x10xf32>, vector<2x10xf32> -> vector<2x10xf32>
    %564 = vector.broadcast %394 : vector<1x10xf32> to vector<2x10xf32>
    %565 = arith.addf %563, %564 : vector<2x10xf32>
    %cst_310 = arith.constant dense<0.000000e+00> : vector<2x10xf32>
    %566 = tpu.matmul %558, %388, %cst_310 {dimension_numbers = #tpu.dot_dimension_numbers<[1], [0], [0], [1], [0, 0, 1, 1], [], []>} : vector<2x10xf32>, vector<10x10xf32>, vector<2x10xf32> -> vector<2x10xf32>
    %567 = vector.broadcast %396 : vector<1x10xf32> to vector<2x10xf32>
    %568 = arith.addf %566, %567 : vector<2x10xf32>
    %cst_311 = arith.constant dense<0.000000e+00> : vector<2x10xf32>
    %569 = tpu.matmul %558, %390, %cst_311 {dimension_numbers = #tpu.dot_dimension_numbers<[1], [0], [0], [1], [0, 0, 1, 1], [], []>} : vector<2x10xf32>, vector<10x10xf32>, vector<2x10xf32> -> vector<2x10xf32>
    %570 = vector.broadcast %398 : vector<1x10xf32> to vector<2x10xf32>
    %571 = arith.addf %569, %570 : vector<2x10xf32>
    %cst_312 = arith.constant 5.000000e-01 : f32
    %572 = vector.broadcast %cst_312 : f32 to vector<2x10xf32>
    %573 = arith.mulf %572, %562 : vector<2x10xf32>
    %574 = math.tanh %573 : vector<2x10xf32>
    %cst_313 = arith.constant 1.000000e+00 : f32
    %575 = vector.broadcast %cst_313 : f32 to vector<2x10xf32>
    %576 = arith.addf %574, %575 : vector<2x10xf32>
    %cst_314 = arith.constant 5.000000e-01 : f32
    %577 = vector.broadcast %cst_314 : f32 to vector<2x10xf32>
    %578 = arith.mulf %577, %576 : vector<2x10xf32>
    %cst_315 = arith.constant 5.000000e-01 : f32
    %579 = vector.broadcast %cst_315 : f32 to vector<2x10xf32>
    %580 = arith.mulf %579, %565 : vector<2x10xf32>
    %581 = math.tanh %580 : vector<2x10xf32>
    %cst_316 = arith.constant 1.000000e+00 : f32
    %582 = vector.broadcast %cst_316 : f32 to vector<2x10xf32>
    %583 = arith.addf %581, %582 : vector<2x10xf32>
    %cst_317 = arith.constant 5.000000e-01 : f32
    %584 = vector.broadcast %cst_317 : f32 to vector<2x10xf32>
    %585 = arith.mulf %584, %583 : vector<2x10xf32>
    %586 = math.tanh %568 : vector<2x10xf32>
    %cst_318 = arith.constant 5.000000e-01 : f32
    %587 = vector.broadcast %cst_318 : f32 to vector<2x10xf32>
    %588 = arith.mulf %587, %571 : vector<2x10xf32>
    %589 = math.tanh %588 : vector<2x10xf32>
    %cst_319 = arith.constant 1.000000e+00 : f32
    %590 = vector.broadcast %cst_319 : f32 to vector<2x10xf32>
    %591 = arith.addf %589, %590 : vector<2x10xf32>
    %cst_320 = arith.constant 5.000000e-01 : f32
    %592 = vector.broadcast %cst_320 : f32 to vector<2x10xf32>
    %593 = arith.mulf %592, %591 : vector<2x10xf32>
    %594 = arith.mulf %585, %556 : vector<2x10xf32>
    %595 = arith.mulf %578, %586 : vector<2x10xf32>
    %596 = arith.addf %594, %595 : vector<2x10xf32>
    %597 = math.tanh %596 : vector<2x10xf32>
    %598 = arith.mulf %593, %597 : vector<2x10xf32>
    %c8_321 = arith.constant 8 : index
    %c0_322 = arith.constant 0 : index
    %599 = vector.load %arg16[%c8_321, %c0_322] : memref<16x10xf32, #tpu.memory_space<vmem>>, vector<2x10xf32>
    tpu.vector_store %arg16[%c8_321, %c0_322], %598 {strides = array<i32>} : memref<16x10xf32, #tpu.memory_space<vmem>>, vector<2x10xf32>,
    %cst_323 = arith.constant dense<0.000000e+00> : vector<2x10xf32>
    %600 = tpu.matmul %598, %384, %cst_323 {dimension_numbers = #tpu.dot_dimension_numbers<[1], [0], [0], [1], [0, 0, 1, 1], [], []>} : vector<2x10xf32>, vector<10x10xf32>, vector<2x10xf32> -> vector<2x10xf32>
    %601 = vector.broadcast %392 : vector<1x10xf32> to vector<2x10xf32>
    %602 = arith.addf %600, %601 : vector<2x10xf32>
    %cst_324 = arith.constant dense<0.000000e+00> : vector<2x10xf32>
    %603 = tpu.matmul %598, %386, %cst_324 {dimension_numbers = #tpu.dot_dimension_numbers<[1], [0], [0], [1], [0, 0, 1, 1], [], []>} : vector<2x10xf32>, vector<10x10xf32>, vector<2x10xf32> -> vector<2x10xf32>
    %604 = vector.broadcast %394 : vector<1x10xf32> to vector<2x10xf32>
    %605 = arith.addf %603, %604 : vector<2x10xf32>
    %cst_325 = arith.constant dense<0.000000e+00> : vector<2x10xf32>
    %606 = tpu.matmul %598, %388, %cst_325 {dimension_numbers = #tpu.dot_dimension_numbers<[1], [0], [0], [1], [0, 0, 1, 1], [], []>} : vector<2x10xf32>, vector<10x10xf32>, vector<2x10xf32> -> vector<2x10xf32>
    %607 = vector.broadcast %396 : vector<1x10xf32> to vector<2x10xf32>
    %608 = arith.addf %606, %607 : vector<2x10xf32>
    %cst_326 = arith.constant dense<0.000000e+00> : vector<2x10xf32>
    %609 = tpu.matmul %598, %390, %cst_326 {dimension_numbers = #tpu.dot_dimension_numbers<[1], [0], [0], [1], [0, 0, 1, 1], [], []>} : vector<2x10xf32>, vector<10x10xf32>, vector<2x10xf32> -> vector<2x10xf32>
    %610 = vector.broadcast %398 : vector<1x10xf32> to vector<2x10xf32>
    %611 = arith.addf %609, %610 : vector<2x10xf32>
    %cst_327 = arith.constant 5.000000e-01 : f32
    %612 = vector.broadcast %cst_327 : f32 to vector<2x10xf32>
    %613 = arith.mulf %612, %602 : vector<2x10xf32>
    %614 = math.tanh %613 : vector<2x10xf32>
    %cst_328 = arith.constant 1.000000e+00 : f32
    %615 = vector.broadcast %cst_328 : f32 to vector<2x10xf32>
    %616 = arith.addf %614, %615 : vector<2x10xf32>
    %cst_329 = arith.constant 5.000000e-01 : f32
    %617 = vector.broadcast %cst_329 : f32 to vector<2x10xf32>
    %618 = arith.mulf %617, %616 : vector<2x10xf32>
    %cst_330 = arith.constant 5.000000e-01 : f32
    %619 = vector.broadcast %cst_330 : f32 to vector<2x10xf32>
    %620 = arith.mulf %619, %605 : vector<2x10xf32>
    %621 = math.tanh %620 : vector<2x10xf32>
    %cst_331 = arith.constant 1.000000e+00 : f32
    %622 = vector.broadcast %cst_331 : f32 to vector<2x10xf32>
    %623 = arith.addf %621, %622 : vector<2x10xf32>
    %cst_332 = arith.constant 5.000000e-01 : f32
    %624 = vector.broadcast %cst_332 : f32 to vector<2x10xf32>
    %625 = arith.mulf %624, %623 : vector<2x10xf32>
    %626 = math.tanh %608 : vector<2x10xf32>
    %cst_333 = arith.constant 5.000000e-01 : f32
    %627 = vector.broadcast %cst_333 : f32 to vector<2x10xf32>
    %628 = arith.mulf %627, %611 : vector<2x10xf32>
    %629 = math.tanh %628 : vector<2x10xf32>
    %cst_334 = arith.constant 1.000000e+00 : f32
    %630 = vector.broadcast %cst_334 : f32 to vector<2x10xf32>
    %631 = arith.addf %629, %630 : vector<2x10xf32>
    %cst_335 = arith.constant 5.000000e-01 : f32
    %632 = vector.broadcast %cst_335 : f32 to vector<2x10xf32>
    %633 = arith.mulf %632, %631 : vector<2x10xf32>
    %634 = arith.mulf %625, %596 : vector<2x10xf32>
    %635 = arith.mulf %618, %626 : vector<2x10xf32>
    %636 = arith.addf %634, %635 : vector<2x10xf32>
    %637 = math.tanh %636 : vector<2x10xf32>
    %638 = arith.mulf %633, %637 : vector<2x10xf32>
    %c10_336 = arith.constant 10 : index
    %c0_337 = arith.constant 0 : index
    %639 = vector.load %arg16[%c10_336, %c0_337] : memref<16x10xf32, #tpu.memory_space<vmem>>, vector<2x10xf32>
    tpu.vector_store %arg16[%c10_336, %c0_337], %638 {strides = array<i32>} : memref<16x10xf32, #tpu.memory_space<vmem>>, vector<2x10xf32>,
    %cst_338 = arith.constant dense<0.000000e+00> : vector<2x10xf32>
    %640 = tpu.matmul %638, %384, %cst_338 {dimension_numbers = #tpu.dot_dimension_numbers<[1], [0], [0], [1], [0, 0, 1, 1], [], []>} : vector<2x10xf32>, vector<10x10xf32>, vector<2x10xf32> -> vector<2x10xf32>
    %641 = vector.broadcast %392 : vector<1x10xf32> to vector<2x10xf32>
    %642 = arith.addf %640, %641 : vector<2x10xf32>
    %cst_339 = arith.constant dense<0.000000e+00> : vector<2x10xf32>
    %643 = tpu.matmul %638, %386, %cst_339 {dimension_numbers = #tpu.dot_dimension_numbers<[1], [0], [0], [1], [0, 0, 1, 1], [], []>} : vector<2x10xf32>, vector<10x10xf32>, vector<2x10xf32> -> vector<2x10xf32>
    %644 = vector.broadcast %394 : vector<1x10xf32> to vector<2x10xf32>
    %645 = arith.addf %643, %644 : vector<2x10xf32>
    %cst_340 = arith.constant dense<0.000000e+00> : vector<2x10xf32>
    %646 = tpu.matmul %638, %388, %cst_340 {dimension_numbers = #tpu.dot_dimension_numbers<[1], [0], [0], [1], [0, 0, 1, 1], [], []>} : vector<2x10xf32>, vector<10x10xf32>, vector<2x10xf32> -> vector<2x10xf32>
    %647 = vector.broadcast %396 : vector<1x10xf32> to vector<2x10xf32>
    %648 = arith.addf %646, %647 : vector<2x10xf32>
    %cst_341 = arith.constant dense<0.000000e+00> : vector<2x10xf32>
    %649 = tpu.matmul %638, %390, %cst_341 {dimension_numbers = #tpu.dot_dimension_numbers<[1], [0], [0], [1], [0, 0, 1, 1], [], []>} : vector<2x10xf32>, vector<10x10xf32>, vector<2x10xf32> -> vector<2x10xf32>
    %650 = vector.broadcast %398 : vector<1x10xf32> to vector<2x10xf32>
    %651 = arith.addf %649, %650 : vector<2x10xf32>
    %cst_342 = arith.constant 5.000000e-01 : f32
    %652 = vector.broadcast %cst_342 : f32 to vector<2x10xf32>
    %653 = arith.mulf %652, %642 : vector<2x10xf32>
    %654 = math.tanh %653 : vector<2x10xf32>
    %cst_343 = arith.constant 1.000000e+00 : f32
    %655 = vector.broadcast %cst_343 : f32 to vector<2x10xf32>
    %656 = arith.addf %654, %655 : vector<2x10xf32>
    %cst_344 = arith.constant 5.000000e-01 : f32
    %657 = vector.broadcast %cst_344 : f32 to vector<2x10xf32>
    %658 = arith.mulf %657, %656 : vector<2x10xf32>
    %cst_345 = arith.constant 5.000000e-01 : f32
    %659 = vector.broadcast %cst_345 : f32 to vector<2x10xf32>
    %660 = arith.mulf %659, %645 : vector<2x10xf32>
    %661 = math.tanh %660 : vector<2x10xf32>
    %cst_346 = arith.constant 1.000000e+00 : f32
    %662 = vector.broadcast %cst_346 : f32 to vector<2x10xf32>
    %663 = arith.addf %661, %662 : vector<2x10xf32>
    %cst_347 = arith.constant 5.000000e-01 : f32
    %664 = vector.broadcast %cst_347 : f32 to vector<2x10xf32>
    %665 = arith.mulf %664, %663 : vector<2x10xf32>
    %666 = math.tanh %648 : vector<2x10xf32>
    %cst_348 = arith.constant 5.000000e-01 : f32
    %667 = vector.broadcast %cst_348 : f32 to vector<2x10xf32>
    %668 = arith.mulf %667, %651 : vector<2x10xf32>
    %669 = math.tanh %668 : vector<2x10xf32>
    %cst_349 = arith.constant 1.000000e+00 : f32
    %670 = vector.broadcast %cst_349 : f32 to vector<2x10xf32>
    %671 = arith.addf %669, %670 : vector<2x10xf32>
    %cst_350 = arith.constant 5.000000e-01 : f32
    %672 = vector.broadcast %cst_350 : f32 to vector<2x10xf32>
    %673 = arith.mulf %672, %671 : vector<2x10xf32>
    %674 = arith.mulf %665, %636 : vector<2x10xf32>
    %675 = arith.mulf %658, %666 : vector<2x10xf32>
    %676 = arith.addf %674, %675 : vector<2x10xf32>
    %677 = math.tanh %676 : vector<2x10xf32>
    %678 = arith.mulf %673, %677 : vector<2x10xf32>
    %c12_351 = arith.constant 12 : index
    %c0_352 = arith.constant 0 : index
    %679 = vector.load %arg16[%c12_351, %c0_352] : memref<16x10xf32, #tpu.memory_space<vmem>>, vector<2x10xf32>
    tpu.vector_store %arg16[%c12_351, %c0_352], %678 {strides = array<i32>} : memref<16x10xf32, #tpu.memory_space<vmem>>, vector<2x10xf32>,
    %cst_353 = arith.constant dense<0.000000e+00> : vector<2x10xf32>
    %680 = tpu.matmul %678, %384, %cst_353 {dimension_numbers = #tpu.dot_dimension_numbers<[1], [0], [0], [1], [0, 0, 1, 1], [], []>} : vector<2x10xf32>, vector<10x10xf32>, vector<2x10xf32> -> vector<2x10xf32>
    %681 = vector.broadcast %392 : vector<1x10xf32> to vector<2x10xf32>
    %682 = arith.addf %680, %681 : vector<2x10xf32>
    %cst_354 = arith.constant dense<0.000000e+00> : vector<2x10xf32>
    %683 = tpu.matmul %678, %386, %cst_354 {dimension_numbers = #tpu.dot_dimension_numbers<[1], [0], [0], [1], [0, 0, 1, 1], [], []>} : vector<2x10xf32>, vector<10x10xf32>, vector<2x10xf32> -> vector<2x10xf32>
    %684 = vector.broadcast %394 : vector<1x10xf32> to vector<2x10xf32>
    %685 = arith.addf %683, %684 : vector<2x10xf32>
    %cst_355 = arith.constant dense<0.000000e+00> : vector<2x10xf32>
    %686 = tpu.matmul %678, %388, %cst_355 {dimension_numbers = #tpu.dot_dimension_numbers<[1], [0], [0], [1], [0, 0, 1, 1], [], []>} : vector<2x10xf32>, vector<10x10xf32>, vector<2x10xf32> -> vector<2x10xf32>
    %687 = vector.broadcast %396 : vector<1x10xf32> to vector<2x10xf32>
    %688 = arith.addf %686, %687 : vector<2x10xf32>
    %cst_356 = arith.constant dense<0.000000e+00> : vector<2x10xf32>
    %689 = tpu.matmul %678, %390, %cst_356 {dimension_numbers = #tpu.dot_dimension_numbers<[1], [0], [0], [1], [0, 0, 1, 1], [], []>} : vector<2x10xf32>, vector<10x10xf32>, vector<2x10xf32> -> vector<2x10xf32>
    %690 = vector.broadcast %398 : vector<1x10xf32> to vector<2x10xf32>
    %691 = arith.addf %689, %690 : vector<2x10xf32>
    %cst_357 = arith.constant 5.000000e-01 : f32
    %692 = vector.broadcast %cst_357 : f32 to vector<2x10xf32>
    %693 = arith.mulf %692, %682 : vector<2x10xf32>
    %694 = math.tanh %693 : vector<2x10xf32>
    %cst_358 = arith.constant 1.000000e+00 : f32
    %695 = vector.broadcast %cst_358 : f32 to vector<2x10xf32>
    %696 = arith.addf %694, %695 : vector<2x10xf32>
    %cst_359 = arith.constant 5.000000e-01 : f32
    %697 = vector.broadcast %cst_359 : f32 to vector<2x10xf32>
    %698 = arith.mulf %697, %696 : vector<2x10xf32>
    %cst_360 = arith.constant 5.000000e-01 : f32
    %699 = vector.broadcast %cst_360 : f32 to vector<2x10xf32>
    %700 = arith.mulf %699, %685 : vector<2x10xf32>
    %701 = math.tanh %700 : vector<2x10xf32>
    %cst_361 = arith.constant 1.000000e+00 : f32
    %702 = vector.broadcast %cst_361 : f32 to vector<2x10xf32>
    %703 = arith.addf %701, %702 : vector<2x10xf32>
    %cst_362 = arith.constant 5.000000e-01 : f32
    %704 = vector.broadcast %cst_362 : f32 to vector<2x10xf32>
    %705 = arith.mulf %704, %703 : vector<2x10xf32>
    %706 = math.tanh %688 : vector<2x10xf32>
    %cst_363 = arith.constant 5.000000e-01 : f32
    %707 = vector.broadcast %cst_363 : f32 to vector<2x10xf32>
    %708 = arith.mulf %707, %691 : vector<2x10xf32>
    %709 = math.tanh %708 : vector<2x10xf32>
    %cst_364 = arith.constant 1.000000e+00 : f32
    %710 = vector.broadcast %cst_364 : f32 to vector<2x10xf32>
    %711 = arith.addf %709, %710 : vector<2x10xf32>
    %cst_365 = arith.constant 5.000000e-01 : f32
    %712 = vector.broadcast %cst_365 : f32 to vector<2x10xf32>
    %713 = arith.mulf %712, %711 : vector<2x10xf32>
    %714 = arith.mulf %705, %676 : vector<2x10xf32>
    %715 = arith.mulf %698, %706 : vector<2x10xf32>
    %716 = arith.addf %714, %715 : vector<2x10xf32>
    %717 = math.tanh %716 : vector<2x10xf32>
    %718 = arith.mulf %713, %717 : vector<2x10xf32>
    %c14_366 = arith.constant 14 : index
    %c0_367 = arith.constant 0 : index
    %719 = vector.load %arg16[%c14_366, %c0_367] : memref<16x10xf32, #tpu.memory_space<vmem>>, vector<2x10xf32>
    tpu.vector_store %arg16[%c14_366, %c0_367], %718 {strides = array<i32>} : memref<16x10xf32, #tpu.memory_space<vmem>>, vector<2x10xf32>,
    %c0_368 = arith.constant 0 : index
    %c0_369 = arith.constant 0 : index
    %720 = vector.load %arg16[%c0_368, %c0_369] : memref<16x10xf32, #tpu.memory_space<vmem>>, vector<16x10xf32>
    %c0_370 = arith.constant 0 : index
    %c0_371 = arith.constant 0 : index
    %721 = vector.load %arg9[%c0_370, %c0_371] : memref<10x3xf32, #tpu.memory_space<vmem>>, vector<10x3xf32>
    %cst_372 = arith.constant dense<0.000000e+00> : vector<16x3xf32>
    %722 = tpu.matmul %720, %721, %cst_372 {dimension_numbers = #tpu.dot_dimension_numbers<[1], [0], [0], [1], [0, 0, 1, 1], [], []>} : vector<16x10xf32>, vector<10x3xf32>, vector<16x3xf32> -> vector<16x3xf32>
    %c0_373 = arith.constant 0 : index
    %c0_374 = arith.constant 0 : index
    %723 = vector.load %arg10[%c0_373, %c0_374] : memref<1x3xf32, #tpu.memory_space<vmem>>, vector<1x3xf32>
    %724 = vector.broadcast %723 : vector<1x3xf32> to vector<16x3xf32>
    %725 = arith.addf %722, %724 : vector<16x3xf32>
    %c0_375 = arith.constant 0 : index
    %c0_376 = arith.constant 0 : index
    %726 = vector.load %arg11[%c0_375, %c0_376] : memref<16x3xf32, #tpu.memory_space<vmem>>, vector<16x3xf32>
    tpu.vector_store %arg11[%c0_375, %c0_376], %725 {strides = array<i32>} : memref<16x3xf32, #tpu.memory_space<vmem>>, vector<16x3xf32>,
    return
  }
}

</mosaic_0001>

<bundles_post_ra>
// kernel: tpu_custom_call.1
= control target key start
LH: loop header
LB: loop body
LE: loop exit
PB: predicated region body
PF: predicated region fallthrough
CT: control target
= control target key end

     0   :  { %vm103_vm0 = vcmask 1043456   ;;  %vm40_vm1 = vcmask 31744   ;;  %v2411_v3 = vmov 16.0   ;;  %vm253_vm3 = vcmask 1041408   ;;  %s2957_s2 = inlined_call_operand.vmem [shape: f32[4,4,10], index: 2, kind: input, shape index: {}]   ;;  %s2958_s0 = inlined_call_operand.vmem [shape: f32[16,4], index: 0, kind: input, shape index: {}]   ;;  %s2959_s1 = inlined_call_operand.vmem [shape: f32[2,4], index: 1, kind: input, shape index: {}]   ;;  %s2960_s4 = inlined_call_operand.vmem [shape: f32[4,1,10], index: 4, kind: input, shape index: {}]   ;;  %s2961_s3 = inlined_call_operand.vmem [shape: f32[4,10,10], index: 3, kind: input, shape index: {}]   ;;  %s2962_s6 = inlined_call_operand.vmem [shape: f32[1,10], index: 6, kind: input, shape index: {}]   ;;  %s2963_s5 = inlined_call_operand.vmem [shape: f32[10,10], index: 5, kind: input, shape index: {}]   ;;  %s2964_s7 = inlined_call_operand.vmem [shape: f32[4,10,10], index: 7, kind: input, shape index: {}]   ;;  %s2965_s8 = inlined_call_operand.vmem [shape: f32[4,1,10], index: 8, kind: input, shape index: {}]   ;;  %s2966_s9 = inlined_call_operand.vmem [shape: f32[10,3], index: 9, kind: input, shape index: {}]   ;;  %s2967_s10 = inlined_call_operand.vmem [shape: f32[1,3], index: 10, kind: input, shape index: {}]   ;;  %s2968_s11 = inlined_call_operand.vmem [shape: f32[16,3], index: 11, kind: output, shape index: {}]  }
   0x1   :  { %v2074_v0 = vld [vmem:[%s2957_s2 + $0x4] sm:$0xf]  ;;  %v39_v2 = vld [vmem:[%s2958_s0 + $0x8] sm:$0xff]  ;;  %2247 = vrcp.f32 %v2411_v3  ;;  %v92_v34 = vld [vmem:[%s2957_s2] sm:$0xf]  ;;  %v2412_v61 = vmov 0.0  }
   0x2   :  { %v38_v1 = vld [vmem:[%s2958_s0] sm:$0xff]  ;;  %2233 = vmatpush.msk.msra.mxu2 %vm103_vm0, %v2074_v0  ;;  %v42_v5 = vsel %vm40_vm1, %v39_v2, 0.0  ;;  %2076 = vmatpush.msk.msra.mxu1 %vm103_vm0, %v2074_v0  ;;  %v2079_v33 = vld [vmem:[%s2957_s2 + $0x8] sm:$0xf]  ;;  %v2084_v35 = vld [vmem:[%s2957_s2 + $0xc] sm:$0xf] }
   0x3   :  { %v41_v4 = vsel %vm40_vm1, %v38_v1, 0.0  ;;  %2071 = vmatpush.msk.msra.mxu0 %vm103_vm0, %v92_v34  ;;  %2086 = vmatpush.msk.msra.mxu3 %vm103_vm0, %v2084_v35  ;;  %v2503_v38 = vld [vmem:[%s2961_s3 + $0x8] sm:$0x3]  ;;  %v2510_v39 = vld [vmem:[%s2961_s3 + $0x38] sm:$0x3]  ;;  %v2517_v43 = vld [vmem:[%s2961_s3] sm:$0xff] }
   0x4   :  { %v43_v6 = vadd.f32 %v42_v5, %v41_v4  ;;  %2081 = vmatpush.msk.msrb.mxu2 %vm103_vm0, %v2079_v33  ;;  %v2522_v44 = vld [vmem:[%s2961_s3 + $0x18] sm:$0x3]  ;;  %v2530_v46 = vld [vmem:[%s2961_s3 + $0x10] sm:$0xff]  ;;  %v72_v49 = vld [vmem:[%s2959_s1] sm:$0x1]  ;;  %vm130_vm7 = vcmask 80896  }
   0x5   :  { %2095 = vmatpush.msk.msrb.mxu0 %vm253_vm3, %v2503_v38  ;;  %2098 = vmatpush.msk.msrb.mxu3 %vm253_vm3, %v2510_v39  ;;  %v2535_v47 = vld [vmem:[%s2961_s3 + $0x30] sm:$0xff]  ;;  %v2236_v54 = vld [vmem:[%s2959_s1 + $0x1] ss:$0 sm:$0xff]  ;;  %v2548_v59 = vld [vmem:[%s2961_s3 + $0x28] sm:$0x3]  ;;  %vm1308_vm8 = vcmask 74752  }
   0x6   :  { %v44_v7 = vrot.slane %v43_v6, 4  ;;  %2096 = vmatpush.msk.msrb.mxu1 %vm253_vm3, %v2522_v44  ;;  %v2555_v60 = vld [vmem:[%s2961_s3 + $0x20] sm:$0xff]  ;;  %vm2064_vm9 = vcmask 23552  }
   0x7   :  { %v2248_v8 = vpop.eup %2247  ;;  %272 = vmatpush.msrb.mxu0 %v2517_v43  ;;  %347 = vmatpush.msrb.mxu3 %v2535_v47  ;;  %v2237_v62 = vld [vmem:[%s2960_s4] ss:$0 sm:$0xff]  ;;  %v2239_v4 = vld [vmem:[%s2960_s4 + $0x3] ss:$0 sm:$0xff] }
   0x8   :  { %v45_v9 = vadd.f32 %v44_v7, %v43_v6  ;;  %v51_v10 = vmul.f32 16.0, %v2248_v8  ;;  %vm55_vm2 = vweird.f32 %v2248_v8  ;;  %297 = vmatpush.msrb.mxu1 %v2530_v46 }
   0xa   :  { %v46_v11 = vrot.slane %v45_v9, 2  ;;  %v52_v12 = vsub.f32 1.0, %v51_v10 }
   0xc   :  { %v47_v13 = vadd.f32 %v46_v11, %v45_v9  ;;  %v53_v14 = vmul.f32 %v2248_v8, %v52_v12  ;;  %v2240_v12 = vld [vmem:[%s2960_s4 + $0x2] ss:$0 sm:$0xff] }
   0xe   :  { %v48_v15 = vrot.slane %v47_v13, 1  ;;  %v54_v16 = vadd.f32 %v2248_v8, %v53_v14 }
  0x10   :  { %v49_v17 = vadd.f32 %v48_v15, %v47_v13  ;;  %v56_v18 = vsel %vm55_vm2, %v2248_v8, %v54_v16 }
  0x12   :  { %v57_v19 = vmul.f32 %v56_v18, %v49_v17 }
  0x14   :  { %v58_v20 = vsub.f32 %v38_v1, %v57_v19  ;;  %v59_v21 = vsub.f32 %v39_v2, %v57_v19  ;;  %v2238_v1 = vld [vmem:[%s2960_s4 + $0x1] ss:$0 sm:$0xff] }
  0x16   :  { %v60_v22 = vmul.f32 %v58_v20, %v58_v20  ;;  %v61_v23 = vmul.f32 %v59_v21, %v59_v21 }
  0x18   :  { %v62_v24 = vsel %vm40_vm1, %v60_v22, 0.0  ;;  %v63_v25 = vsel %vm40_vm1, %v61_v23, 0.0 }
  0x19   :  { %v64_v26 = vadd.f32 %v63_v25, %v62_v24 }
  0x1b   :  { %v65_v27 = vrot.slane %v64_v26, 4 }
  0x1d   :  { %v66_v28 = vadd.f32 %v65_v27, %v64_v26 }
  0x1f   :  { %v67_v29 = vrot.slane %v66_v28, 2 }
  0x21   :  { %v68_v30 = vadd.f32 %v67_v29, %v66_v28 }
  0x23   :  { %v69_v31 = vrot.slane %v68_v30, 1 }
  0x25   :  { %v70_v32 = vadd.f32 %v69_v31, %v68_v30 }
  0x27   :  { %v71_v36 = vmul.f32 %v70_v32, %v56_v18 }
  0x29   :  { %v74_v37 = vadd.f32 1e-05, %v71_v36 }
  0x2b   :  { %2249 = vrsqrt.f32 %v74_v37  ;;  %vm81_vm4 = vweird.f32 %v74_v37 }
  0x31   :  { %v2250_v40 = vpop.eup %2249 }
  0x32   :  { %v76_v41 = vmul.f32 %v2250_v40, %v74_v37  ;;  %vm82_vm5 = vweird.f32 %v2250_v40 }
  0x33   :  { %vm83_vm6 = vmor %vm81_vm4, %vm82_vm5 }
  0x34   :  { %v77_v42 = vmul.f32 %v2250_v40, %v76_v41 }
  0x36   :  { %v78_v45 = vmul.f32 0.5, %v77_v42 }
  0x38   :  { %v79_v48 = vsub.f32 1.5, %v78_v45 }
  0x3a   :  { %v80_v50 = vmul.f32 %v2250_v40, %v79_v48 }
  0x3c   :  { %v84_v51 = vsel %vm83_vm6, %v2250_v40, %v80_v50 }
  0x3d   :  { %v85_v52 = vmul.f32 %v84_v51, %v72_v49 }
  0x3f   :  { %v86_v53 = vperm.slane %v85_v52, 0 }
  0x41   :  { %v88_v55 = vmul.f32 %v86_v53, %v59_v21  ;;  %v87_v56 = vmul.f32 %v86_v53, %v58_v20 }
  0x43   :  { %v91_v57 = vadd.f32 %v2236_v54, %v88_v55  ;;  %v90_v58 = vadd.f32 %v2236_v54, %v87_v56 }
  0x45   :  { %2078 = vmatmul.msk.f32.vlgmr.msra.gmra.mxu2 %vm40_vm1, %v91_v57  ;;  %2072 = vmatmul.msk.f32.vlgmr.msra.gmra.mxu0 %vm40_vm1, %v90_v58 }
  0x46   :  { %2087 = vmatmul.msk.f32.vlgmr.msra.gmra.mxu3 %vm40_vm1, %v90_v58  ;;  %2097 = vmatpush.msk.msra.mxu2 %vm253_vm3, %v2548_v59 }
  0x47   :  { %2077 = vmatmul.msk.f32.vlgmr.msra.gmra.mxu1 %vm40_vm1, %v90_v58  ;;  %2099 = vmatpush.msk.msra.mxu0 %vm253_vm3, %v2503_v38 }
  0x48   :  { %322 = vmatpush.msra.mxu2 %v2555_v60  ;;  %2101 = vmatpush.msk.msra.mxu1 %vm253_vm3, %v2522_v44 }
  0x49   :  { %390 = vmatpush.msra.mxu0 %v2517_v43  ;;  %2105 = vmatpush.msk.msra.mxu3 %vm253_vm3, %v2510_v39 }
  0x4a   :  { %412 = vmatpush.msra.mxu1 %v2530_v46 }
  0x4b   :  { %456 = vmatpush.msra.mxu3 %v2535_v47 }
  0x4d   :  { %2082 = vmatmul.msk.f32.vlgmr.msrb.gmra.mxu2 %vm40_vm1, %v90_v58  ;;  %2073 = vmatmul.msk.f32.gmra.mxu0 %vm40_vm1, %v91_v57 }
  0x4e   :  { %2088 = vmatmul.msk.f32.gmra.mxu3 %vm40_vm1, %v91_v57  ;;  %2103 = vmatpush.msk.msrb.mxu2 %vm253_vm3, %v2548_v59 }
  0x4f   :  { %298 = vmatmul.f32.vlgmr.msrb.gmra.mxu1 %v2412_v61 }
  0x50   :  { %434 = vmatpush.msrb.mxu2 %v2555_v60  ;;  %2109 = vmatpush.msk.msrb.mxu1 %vm253_vm3, %v2522_v44 }
  0x52   :  { %521 = vmatpush.msrb.mxu1 %v2530_v46 }
  0x55   :  { %2083 = vmatmul.msk.f32.gmra.mxu2 %vm40_vm1, %v91_v57  ;;  %273 = vmatmul.f32.vlgmr.msrb.gmra.mxu0 %v2412_v61 }
  0x56   :  { %348 = vmatmul.f32.vlgmr.msrb.gmra.mxu3 %v2412_v61  ;;  %2107 = vmatpush.msk.msrb.mxu0 %vm253_vm3, %v2503_v38 }
  0x57   :  { %2113 = vmatpush.msk.msrb.mxu3 %vm253_vm3, %v2510_v39 }
  0x58   :  { %499 = vmatpush.msrb.mxu0 %v2517_v43 }
  0x59   :  { %565 = vmatpush.msrb.mxu3 %v2535_v47 }
  0x5d   :  { %323 = vmatmul.f32.vlgmr.msra.gmra.mxu2 %v2412_v61 }
  0x5e   :  { %2111 = vmatpush.msk.msra.mxu2 %vm253_vm3, %v2548_v59 }
  0x60   :  { %543 = vmatpush.msra.mxu2 %v2555_v60 }
  0xc2   :  { %v124_v63 = vpop.f32.mrf.mxu0 }
  0xc3   :  { %v125_v0 = vadd.f32 %v2237_v62, %v124_v63 }
  0xc4   :  { %v160_v2 = vpop.f32.mrf.mxu1 }
  0xc5   :  { %131 = vst.msk [vmem:[#allocation2] sm:$0xff] %vm130_vm7, %v125_v0  ;;  %v161_v3 = vadd.f32 %v2238_v1, %v160_v2 }
  0xc7   :  { %166 = vst.msk [vmem:[#allocation3] sm:$0xff] %vm130_vm7, %v161_v3 }
  0xc8   :  { %v163_v5 = vpop.f32.mrf.mxu2 }
  0xc9   :  { %v164_v6 = vadd.f32 %v2238_v1, %v163_v5  ;;  %v230_v7 = vpop.f32.mrf.mxu3 }
  0xca   :  { %v127_v8 = vpop.f32.mrf.mxu0  ;;  %v231_v9 = vadd.f32 %v2239_v4, %v230_v7 }
  0xcb   :  { %167 = vst.msk [vmem:[#allocation3 + $0x8] sm:$0xff] %vm130_vm7, %v164_v6  ;;  %v128_v10 = vadd.f32 %v2237_v62, %v127_v8 }
  0xcc   :  { %236 = vst.msk [vmem:[#allocation5] sm:$0xff] %vm130_vm7, %v231_v9  ;;  %v299_v11 = vpop.f32.mrf.mxu1  ;;  %v249_v16 = vld [vmem:[#allocation2] sm:$0x3]  ;;  %v371_v54 = vld [vmem:[#allocation2 + $0x2] sm:$0x3] }
  0xcd   :  { %132 = vst.msk [vmem:[#allocation2 + $0x8] sm:$0xff] %vm130_vm7, %v128_v10 }
  0xce   :  { %v278_v13 = vld [vmem:[#allocation3] sm:$0x3]  ;;  %v396_v56 = vld [vmem:[#allocation3 + $0x2] sm:$0x3] }
  0xcf   :  { %v302_v14 = vadd.f32 %v299_v11, %v278_v13 }
  0xd0   :  { %v195_v15 = vpop.f32.mrf.mxu2 }
  0xd1   :  { %v196_v17 = vadd.f32 %v2240_v12, %v195_v15  ;;  %v233_v18 = vpop.f32.mrf.mxu3  ;;  %v357_v22 = vmul.f32 0.5, %v302_v14 }
  0xd2   :  { %v274_v19 = vpop.f32.mrf.mxu0  ;;  %v234_v20 = vadd.f32 %v2239_v4, %v233_v18 }
  0xd3   :  { %201 = vst.msk [vmem:[#allocation4] sm:$0xff] %vm130_vm7, %v196_v17  ;;  %v277_v21 = vadd.f32 %v274_v19, %v249_v16  ;;  %2251 = vtanh.f32 %v357_v22  ;;  %v328_v26 = vld [vmem:[#allocation5] sm:$0x3]  ;;  %v440_v2 = vld [vmem:[#allocation5 + $0x2] sm:$0x3] }
  0xd4   :  { %237 = vst.msk [vmem:[#allocation5 + $0x8] sm:$0xff] %vm130_vm7, %v234_v20  ;;  %v480_v22 = vld [vmem:[#allocation2 + $0x4] sm:$0x3] }
  0xd5   :  { %v353_v23 = vmul.f32 0.5, %v277_v21 }
  0xd7   :  { %2253 = vtanh.f32 %v353_v23 }
  0xd8   :  { %v198_v24 = vpop.f32.mrf.mxu2 }
  0xd9   :  { %v199_v25 = vadd.f32 %v2240_v12, %v198_v24  ;;  %v349_v27 = vpop.f32.mrf.mxu3  ;;  %v2252_v28 = vpop.eup %2251  ;;  %v505_v24 = vld [vmem:[#allocation3 + $0x4] sm:$0x3] }
  0xda   :  { %v352_v29 = vadd.f32 %v349_v27, %v328_v26  ;;  %v359_v30 = vadd.f32 1.0, %v2252_v28  ;;  %v303_v31 = vld [vmem:[#allocation4] sm:$0x3]  ;;  %v418_v0 = vld [vmem:[#allocation4 + $0x2] sm:$0x3] }
  0xdb   :  { %202 = vst.msk [vmem:[#allocation4 + $0x8] sm:$0xff] %vm130_vm7, %v199_v25 }
  0xdc   :  { %v362_v35 = vmul.f32 0.5, %v352_v29  ;;  %v360_v37 = vmul.f32 0.5, %v359_v30  ;;  %v527_v30 = vld [vmem:[#allocation4 + $0x4] sm:$0x3] }
  0xdd   :  { %v2254_v33 = vpop.eup %2253 }
  0xde   :  { %v355_v36 = vadd.f32 1.0, %v2254_v33  ;;  %v366_v41 = vmul.f32 0.0, %v360_v37 }
  0xe0   :  { %v324_v32 = vpop.f32.mrf.mxu2  ;;  %v356_v40 = vmul.f32 0.5, %v355_v36 }
  0xe1   :  { %v327_v34 = vadd.f32 %v324_v32, %v303_v31  ;;  %v549_v32 = vld [vmem:[#allocation5 + $0x4] sm:$0x3] }
  0xe3   :  { %2255 = vtanh.f32 %v327_v34 }
  0xe4   :  { %2257 = vtanh.f32 %v362_v35 }
  0xe9   :  { %v2256_v42 = vpop.eup %2255 }
  0xea   :  { %v367_v45 = vmul.f32 %v2256_v42, %v356_v40  ;;  %v2258_v48 = vpop.eup %2257 }
  0xeb   :  { %v364_v50 = vadd.f32 1.0, %v2258_v48 }
  0xec   :  { %v368_v49 = vadd.f32 %v367_v45, %v366_v41 }
  0xed   :  { %v365_v51 = vmul.f32 0.5, %v364_v50 }
  0xee   :  { %2259 = vtanh.f32 %v368_v49 }
  0xf4   :  { %v2260_v52 = vpop.eup %2259 }
  0xf5   :  { %v370_v53 = vmul.f32 %v2260_v52, %v365_v51 }
  0xf7   :  { %2100 = vmatmul.msk.f32.vlgmr.msra.gmra.mxu0 %vm130_vm7, %v370_v53  ;;  %2102 = vmatmul.msk.f32.vlgmr.msra.gmra.mxu1 %vm130_vm7, %v370_v53 }
  0xf8   :  { %2104 = vmatmul.msk.f32.vlgmr.msrb.gmra.mxu2 %vm130_vm7, %v370_v53  ;;  %2106 = vmatmul.msk.f32.vlgmr.msra.gmra.mxu3 %vm130_vm7, %v370_v53 }
  0xf9   :  { %2115 = vmatpush.msk.msra.mxu0 %vm253_vm3, %v2503_v38  ;;  %2117 = vmatpush.msk.msra.mxu1 %vm253_vm3, %v2522_v44 }
  0xfa   :  { %2119 = vmatpush.msk.msrb.mxu2 %vm253_vm3, %v2548_v59  ;;  %2121 = vmatpush.msk.msra.mxu3 %vm253_vm3, %v2510_v39 }
  0xfb   :  { %608 = vmatpush.msra.mxu0 %v2517_v43  ;;  %630 = vmatpush.msra.mxu1 %v2530_v46 }
  0xfc   :  { %652 = vmatpush.msrb.mxu2 %v2555_v60  ;;  %674 = vmatpush.msra.mxu3 %v2535_v47 }
 0x174   :  { %v392_v55 = vpop.f32.mrf.mxu0  ;;  %v414_v57 = vpop.f32.mrf.mxu1 }
 0x175   :  { %v395_v58 = vadd.f32 %v392_v55, %v371_v54  ;;  %v417_v61 = vadd.f32 %v414_v57, %v396_v56 }
 0x177   :  { %v462_v62 = vmul.f32 0.5, %v395_v58  ;;  %v466_v63 = vmul.f32 0.5, %v417_v61  ;;  %v589_v58 = vld [vmem:[#allocation2 + $0x6] sm:$0x3] }
 0x179   :  { %2261 = vtanh.f32 %v462_v62  ;;  %v614_v62 = vld [vmem:[#allocation3 + $0x6] sm:$0x3] }
 0x17a   :  { %2263 = vtanh.f32 %v466_v63 }
 0x17b   :  { %v436_v1 = vpop.f32.mrf.mxu2  ;;  %v458_v3 = vpop.f32.mrf.mxu3 }
 0x17c   :  { %v439_v4 = vadd.f32 %v436_v1, %v418_v0  ;;  %v461_v5 = vadd.f32 %v458_v3, %v440_v2 }
 0x17e   :  { %2265 = vtanh.f32 %v439_v4  ;;  %v471_v6 = vmul.f32 0.5, %v461_v5  ;;  %v636_v4 = vld [vmem:[#allocation4 + $0x6] sm:$0x3] }
 0x17f   :  { %v2262_v7 = vpop.eup %2261 }
 0x180   :  { %v2264_v8 = vpop.eup %2263  ;;  %v464_v9 = vadd.f32 1.0, %v2262_v7  ;;  %2267 = vtanh.f32 %v471_v6  ;;  %v658_v6 = vld [vmem:[#allocation5 + $0x6] sm:$0x3] }
 0x181   :  { %v468_v10 = vadd.f32 1.0, %v2264_v8 }
 0x182   :  { %v465_v11 = vmul.f32 0.5, %v464_v9 }
 0x183   :  { %v469_v12 = vmul.f32 0.5, %v468_v10 }
 0x184   :  { %v2266_v13 = vpop.eup %2265 }
 0x185   :  { %v475_v14 = vmul.f32 %v469_v12, %v368_v49  ;;  %v476_v15 = vmul.f32 %v2266_v13, %v465_v11 }
 0x186   :  { %v2268_v16 = vpop.eup %2267 }
 0x187   :  { %v477_v17 = vadd.f32 %v476_v15, %v475_v14  ;;  %v473_v18 = vadd.f32 1.0, %v2268_v16 }
 0x189   :  { %2269 = vtanh.f32 %v477_v17  ;;  %v474_v19 = vmul.f32 0.5, %v473_v18 }
 0x18f   :  { %v2270_v20 = vpop.eup %2269 }
 0x190   :  { %v479_v21 = vmul.f32 %v2270_v20, %v474_v19 }
 0x192   :  { %2108 = vmatmul.msk.f32.vlgmr.msrb.gmra.mxu0 %vm130_vm7, %v479_v21  ;;  %2110 = vmatmul.msk.f32.vlgmr.msrb.gmra.mxu1 %vm130_vm7, %v479_v21 }
 0x193   :  { %2112 = vmatmul.msk.f32.vlgmr.msra.gmra.mxu2 %vm130_vm7, %v479_v21  ;;  %2114 = vmatmul.msk.f32.vlgmr.msrb.gmra.mxu3 %vm130_vm7, %v479_v21 }
 0x194   :  { %2123 = vmatpush.msk.msrb.mxu0 %vm253_vm3, %v2503_v38  ;;  %2125 = vmatpush.msk.msrb.mxu1 %vm253_vm3, %v2522_v44 }
 0x195   :  { %2127 = vmatpush.msk.msra.mxu2 %vm253_vm3, %v2548_v59  ;;  %2129 = vmatpush.msk.msrb.mxu3 %vm253_vm3, %v2510_v39 }
 0x196   :  { %717 = vmatpush.msrb.mxu0 %v2517_v43  ;;  %739 = vmatpush.msrb.mxu1 %v2530_v46 }
 0x197   :  { %761 = vmatpush.msra.mxu2 %v2555_v60  ;;  %783 = vmatpush.msrb.mxu3 %v2535_v47 }
 0x20f   :  { %v501_v23 = vpop.f32.mrf.mxu0  ;;  %v523_v25 = vpop.f32.mrf.mxu1 }
 0x210   :  { %v504_v26 = vadd.f32 %v501_v23, %v480_v22  ;;  %v526_v27 = vadd.f32 %v523_v25, %v505_v24 }
 0x212   :  { %v571_v28 = vmul.f32 0.5, %v504_v26  ;;  %v575_v29 = vmul.f32 0.5, %v526_v27  ;;  %v698_v26 = vld [vmem:[#allocation2 + $0x8] sm:$0x3] }
 0x214   :  { %2271 = vtanh.f32 %v571_v28  ;;  %v723_v28 = vld [vmem:[#allocation3 + $0x8] sm:$0x3] }
 0x215   :  { %2273 = vtanh.f32 %v575_v29 }
 0x216   :  { %v545_v31 = vpop.f32.mrf.mxu2  ;;  %v567_v33 = vpop.f32.mrf.mxu3 }
 0x217   :  { %v548_v34 = vadd.f32 %v545_v31, %v527_v30  ;;  %v570_v35 = vadd.f32 %v567_v33, %v549_v32 }
 0x219   :  { %2275 = vtanh.f32 %v548_v34  ;;  %v580_v36 = vmul.f32 0.5, %v570_v35  ;;  %v745_v34 = vld [vmem:[#allocation4 + $0x8] sm:$0x3] }
 0x21a   :  { %v2272_v37 = vpop.eup %2271 }
 0x21b   :  { %v2274_v40 = vpop.eup %2273  ;;  %v573_v41 = vadd.f32 1.0, %v2272_v37  ;;  %2277 = vtanh.f32 %v580_v36  ;;  %v767_v36 = vld [vmem:[#allocation5 + $0x8] sm:$0x3] }
 0x21c   :  { %v577_v42 = vadd.f32 1.0, %v2274_v40 }
 0x21d   :  { %v574_v45 = vmul.f32 0.5, %v573_v41 }
 0x21e   :  { %v578_v48 = vmul.f32 0.5, %v577_v42 }
 0x21f   :  { %v2276_v49 = vpop.eup %2275 }
 0x220   :  { %v584_v50 = vmul.f32 %v578_v48, %v477_v17  ;;  %v585_v51 = vmul.f32 %v2276_v49, %v574_v45 }
 0x221   :  { %v2278_v52 = vpop.eup %2277 }
 0x222   :  { %v586_v53 = vadd.f32 %v585_v51, %v584_v50  ;;  %v582_v54 = vadd.f32 1.0, %v2278_v52 }
 0x224   :  { %2279 = vtanh.f32 %v586_v53  ;;  %v583_v55 = vmul.f32 0.5, %v582_v54 }
 0x22a   :  { %v2280_v56 = vpop.eup %2279 }
 0x22b   :  { %v588_v57 = vmul.f32 %v2280_v56, %v583_v55 }
 0x22d   :  { %2116 = vmatmul.msk.f32.vlgmr.msra.gmra.mxu0 %vm130_vm7, %v588_v57  ;;  %2118 = vmatmul.msk.f32.vlgmr.msra.gmra.mxu1 %vm130_vm7, %v588_v57 }
 0x22e   :  { %2120 = vmatmul.msk.f32.vlgmr.msrb.gmra.mxu2 %vm130_vm7, %v588_v57  ;;  %2122 = vmatmul.msk.f32.vlgmr.msra.gmra.mxu3 %vm130_vm7, %v588_v57 }
 0x22f   :  { %2131 = vmatpush.msk.msra.mxu0 %vm253_vm3, %v2503_v38  ;;  %2133 = vmatpush.msk.msra.mxu1 %vm253_vm3, %v2522_v44 }
 0x230   :  { %2135 = vmatpush.msk.msrb.mxu2 %vm253_vm3, %v2548_v59  ;;  %2137 = vmatpush.msk.msra.mxu3 %vm253_vm3, %v2510_v39 }
 0x231   :  { %826 = vmatpush.msra.mxu0 %v2517_v43  ;;  %848 = vmatpush.msra.mxu1 %v2530_v46 }
 0x232   :  { %870 = vmatpush.msrb.mxu2 %v2555_v60  ;;  %892 = vmatpush.msra.mxu3 %v2535_v47 }
 0x2aa   :  { %v610_v61 = vpop.f32.mrf.mxu0  ;;  %v632_v63 = vpop.f32.mrf.mxu1 }
 0x2ab   :  { %v613_v0 = vadd.f32 %v610_v61, %v589_v58  ;;  %v635_v1 = vadd.f32 %v632_v63, %v614_v62 }
 0x2ad   :  { %v680_v2 = vmul.f32 0.5, %v613_v0  ;;  %v684_v3 = vmul.f32 0.5, %v635_v1  ;;  %v807_v0 = vld [vmem:[#allocation2 + $0xa] sm:$0x3] }
 0x2af   :  { %2281 = vtanh.f32 %v680_v2 }
 0x2b0   :  { %2283 = vtanh.f32 %v684_v3 }
 0x2b1   :  { %v654_v5 = vpop.f32.mrf.mxu2  ;;  %v676_v7 = vpop.f32.mrf.mxu3 }
 0x2b2   :  { %v657_v8 = vadd.f32 %v654_v5, %v636_v4  ;;  %v679_v9 = vadd.f32 %v676_v7, %v658_v6  ;;  %v876_v6 = vld [vmem:[#allocation5 + $0xa] sm:$0x3] }
 0x2b4   :  { %2285 = vtanh.f32 %v657_v8  ;;  %v689_v10 = vmul.f32 0.5, %v679_v9 }
 0x2b5   :  { %v2282_v11 = vpop.eup %2281 }
 0x2b6   :  { %v2284_v12 = vpop.eup %2283  ;;  %v682_v13 = vadd.f32 1.0, %v2282_v11  ;;  %2287 = vtanh.f32 %v689_v10 }
 0x2b7   :  { %v686_v14 = vadd.f32 1.0, %v2284_v12 }
 0x2b8   :  { %v683_v15 = vmul.f32 0.5, %v682_v13 }
 0x2b9   :  { %v687_v16 = vmul.f32 0.5, %v686_v14 }
 0x2ba   :  { %v2286_v17 = vpop.eup %2285 }
 0x2bb   :  { %v693_v18 = vmul.f32 %v687_v16, %v586_v53  ;;  %v694_v19 = vmul.f32 %v2286_v17, %v683_v15 }
 0x2bc   :  { %v2288_v20 = vpop.eup %2287 }
 0x2bd   :  { %v695_v21 = vadd.f32 %v694_v19, %v693_v18  ;;  %v691_v22 = vadd.f32 1.0, %v2288_v20 }
 0x2bf   :  { %2289 = vtanh.f32 %v695_v21  ;;  %v692_v23 = vmul.f32 0.5, %v691_v22  ;;  %v916_v22 = vld [vmem:[#allocation2 + $0xc] sm:$0x3] }
 0x2c5   :  { %v2290_v24 = vpop.eup %2289 }
 0x2c6   :  { %v697_v25 = vmul.f32 %v2290_v24, %v692_v23  ;;  %v941_v24 = vld [vmem:[#allocation3 + $0xc] sm:$0x3] }
 0x2c8   :  { %2124 = vmatmul.msk.f32.vlgmr.msrb.gmra.mxu0 %vm130_vm7, %v697_v25  ;;  %2126 = vmatmul.msk.f32.vlgmr.msrb.gmra.mxu1 %vm130_vm7, %v697_v25 }
 0x2c9   :  { %2128 = vmatmul.msk.f32.vlgmr.msra.gmra.mxu2 %vm130_vm7, %v697_v25  ;;  %2130 = vmatmul.msk.f32.vlgmr.msrb.gmra.mxu3 %vm130_vm7, %v697_v25 }
 0x2ca   :  { %2139 = vmatpush.msk.msrb.mxu0 %vm253_vm3, %v2503_v38  ;;  %2141 = vmatpush.msk.msrb.mxu1 %vm253_vm3, %v2522_v44 }
 0x2cb   :  { %2143 = vmatpush.msk.msra.mxu2 %vm253_vm3, %v2548_v59  ;;  %2145 = vmatpush.msk.msrb.mxu3 %vm253_vm3, %v2510_v39 }
 0x2cc   :  { %935 = vmatpush.msrb.mxu0 %v2517_v43  ;;  %957 = vmatpush.msrb.mxu1 %v2530_v46 }
 0x2cd   :  { %979 = vmatpush.msra.mxu2 %v2555_v60  ;;  %1001 = vmatpush.msrb.mxu3 %v2535_v47 }
 0x345   :  { %v719_v27 = vpop.f32.mrf.mxu0  ;;  %v741_v29 = vpop.f32.mrf.mxu1 }
 0x346   :  { %v722_v30 = vadd.f32 %v719_v27, %v698_v26  ;;  %v744_v31 = vadd.f32 %v741_v29, %v723_v28 }
 0x348   :  { %v789_v32 = vmul.f32 0.5, %v722_v30  ;;  %v793_v33 = vmul.f32 0.5, %v744_v31  ;;  %v963_v30 = vld [vmem:[#allocation4 + $0xc] sm:$0x3] }
 0x34a   :  { %2291 = vtanh.f32 %v789_v32  ;;  %v985_v32 = vld [vmem:[#allocation5 + $0xc] sm:$0x3] }
 0x34b   :  { %2293 = vtanh.f32 %v793_v33 }
 0x34c   :  { %v763_v35 = vpop.f32.mrf.mxu2  ;;  %v785_v37 = vpop.f32.mrf.mxu3 }
 0x34d   :  { %v766_v40 = vadd.f32 %v763_v35, %v745_v34  ;;  %v788_v41 = vadd.f32 %v785_v37, %v767_v36 }
 0x34f   :  { %2295 = vtanh.f32 %v766_v40  ;;  %v798_v42 = vmul.f32 0.5, %v788_v41 }
 0x350   :  { %v2292_v45 = vpop.eup %2291 }
 0x351   :  { %v2294_v48 = vpop.eup %2293  ;;  %v791_v49 = vadd.f32 1.0, %v2292_v45  ;;  %2297 = vtanh.f32 %v798_v42 }
 0x352   :  { %v795_v50 = vadd.f32 1.0, %v2294_v48 }
 0x353   :  { %v792_v51 = vmul.f32 0.5, %v791_v49 }
 0x354   :  { %v796_v52 = vmul.f32 0.5, %v795_v50 }
 0x355   :  { %v2296_v53 = vpop.eup %2295 }
 0x356   :  { %v802_v54 = vmul.f32 %v796_v52, %v695_v21  ;;  %v803_v55 = vmul.f32 %v2296_v53, %v792_v51 }
 0x357   :  { %v2298_v56 = vpop.eup %2297 }
 0x358   :  { %v804_v57 = vadd.f32 %v803_v55, %v802_v54  ;;  %v800_v58 = vadd.f32 1.0, %v2298_v56 }
 0x35a   :  { %2299 = vtanh.f32 %v804_v57  ;;  %v801_v61 = vmul.f32 0.5, %v800_v58  ;;  %v1135_v58 = vld [vmem:[%s2963_s5 + $0x8] sm:$0x3] }
 0x360   :  { %v2300_v62 = vpop.eup %2299 }
 0x361   :  { %v806_v63 = vmul.f32 %v2300_v62, %v801_v61  ;;  %v1134_v61 = vld [vmem:[%s2963_s5] sm:$0xff]  ;;  %v2708_v62 = vld [vmem:[%s2964_s7 + $0x18] sm:$0x3] }
 0x363   :  { %2132 = vmatmul.msk.f32.vlgmr.msra.gmra.mxu0 %vm130_vm7, %v806_v63  ;;  %2134 = vmatmul.msk.f32.vlgmr.msra.gmra.mxu1 %vm130_vm7, %v806_v63 }
 0x364   :  { %2136 = vmatmul.msk.f32.vlgmr.msrb.gmra.mxu2 %vm130_vm7, %v806_v63  ;;  %2138 = vmatmul.msk.f32.vlgmr.msra.gmra.mxu3 %vm130_vm7, %v806_v63  ;;  %v2713_v63 = vld [vmem:[%s2964_s7 + $0x8] sm:$0x3] }
 0x365   :  { %2147 = vmatpush.msk.msra.mxu0 %vm253_vm3, %v2503_v38  ;;  %2149 = vmatpush.msk.msra.mxu1 %vm253_vm3, %v2522_v44  ;;  %v832_v38 = vld [vmem:[#allocation3 + $0xa] sm:$0x3] }
 0x366   :  { %2151 = vmatpush.msk.msrb.mxu2 %vm253_vm3, %v2548_v59  ;;  %2153 = vmatpush.msk.msra.mxu3 %vm253_vm3, %v2510_v39  ;;  %v854_v59 = vld [vmem:[#allocation4 + $0xa] sm:$0x3] }
 0x367   :  { %1044 = vmatpush.msra.mxu0 %v2517_v43  ;;  %1066 = vmatpush.msra.mxu1 %v2530_v46 }
 0x368   :  { %1088 = vmatpush.msrb.mxu2 %v2555_v60  ;;  %1110 = vmatpush.msra.mxu3 %v2535_v47 }
 0x3e0   :  { %v828_v1 = vpop.f32.mrf.mxu0  ;;  %v850_v2 = vpop.f32.mrf.mxu1 }
 0x3e1   :  { %v831_v3 = vadd.f32 %v828_v1, %v807_v0  ;;  %v853_v44 = vadd.f32 %v850_v2, %v832_v38  ;;  %v2718_v0 = vld [vmem:[%s2964_s7 + $0x10] sm:$0xff]  ;;  %v2727_v1 = vld [vmem:[%s2964_s7 + $0x28] sm:$0x3]  ;;  %v1025_v38 = vld [vmem:[#allocation2 + $0xe] sm:$0x3] }
 0x3e3   :  { %v898_v4 = vmul.f32 0.5, %v831_v3  ;;  %v902_v5 = vmul.f32 0.5, %v853_v44  ;;  %v1050_v3 = vld [vmem:[#allocation3 + $0xe] sm:$0x3] }
 0x3e5   :  { %2301 = vtanh.f32 %v898_v4 }
 0x3e6   :  { %2303 = vtanh.f32 %v902_v5 }
 0x3e7   :  { %v872_v39 = vpop.f32.mrf.mxu2  ;;  %v894_v43 = vpop.f32.mrf.mxu3 }
 0x3e8   :  { %v875_v7 = vadd.f32 %v872_v39, %v854_v59  ;;  %v897_v46 = vadd.f32 %v894_v43, %v876_v6  ;;  %v1072_v6 = vld [vmem:[#allocation4 + $0xe] sm:$0x3] }
 0x3ea   :  { %2305 = vtanh.f32 %v875_v7  ;;  %v907_v60 = vmul.f32 0.5, %v897_v46  ;;  %v1094_v7 = vld [vmem:[#allocation5 + $0xe] sm:$0x3] }
 0x3eb   :  { %v2302_v8 = vpop.eup %2301 }
 0x3ec   :  { %v2304_v47 = vpop.eup %2303  ;;  %v900_v9 = vadd.f32 1.0, %v2302_v8  ;;  %2307 = vtanh.f32 %v907_v60 }
 0x3ed   :  { %v904_v10 = vadd.f32 1.0, %v2304_v47 }
 0x3ee   :  { %v901_v11 = vmul.f32 0.5, %v900_v9 }
 0x3ef   :  { %v905_v12 = vmul.f32 0.5, %v904_v10 }
 0x3f0   :  { %v2306_v13 = vpop.eup %2305 }
 0x3f1   :  { %v911_v14 = vmul.f32 %v905_v12, %v804_v57  ;;  %v912_v15 = vmul.f32 %v2306_v13, %v901_v11 }
 0x3f2   :  { %v2308_v16 = vpop.eup %2307 }
 0x3f3   :  { %v913_v17 = vadd.f32 %v912_v15, %v911_v14  ;;  %v909_v18 = vadd.f32 1.0, %v2308_v16 }
 0x3f5   :  { %2309 = vtanh.f32 %v913_v17  ;;  %v910_v19 = vmul.f32 0.5, %v909_v18 }
 0x3fb   :  { %v2310_v20 = vpop.eup %2309 }
 0x3fc   :  { %v915_v21 = vmul.f32 %v2310_v20, %v910_v19 }
 0x3fe   :  { %2140 = vmatmul.msk.f32.vlgmr.msrb.gmra.mxu0 %vm130_vm7, %v915_v21  ;;  %2142 = vmatmul.msk.f32.vlgmr.msrb.gmra.mxu1 %vm130_vm7, %v915_v21 }
 0x3ff   :  { %2144 = vmatmul.msk.f32.vlgmr.msra.gmra.mxu2 %vm130_vm7, %v915_v21  ;;  %2146 = vmatmul.msk.f32.vlgmr.msrb.gmra.mxu3 %vm130_vm7, %v915_v21 }
 0x400   :  { %2155 = vmatpush.msk.msrb.mxu0 %vm253_vm3, %v1135_v58  ;;  %2168 = vmatpush.msk.msra.mxu2 %vm253_vm3, %v2708_v62 }
 0x401   :  { %2166 = vmatpush.msk.msrb.mxu1 %vm253_vm3, %v2713_v63  ;;  %2170 = vmatpush.msk.msrb.mxu3 %vm253_vm3, %v2727_v1 }
 0x402   :  { %1161 = vmatpush.msrb.mxu0 %v1134_v61  ;;  %1234 = vmatpush.msra.mxu2 %v2718_v0 }
 0x47b   :  { %v937_v23 = vpop.f32.mrf.mxu0  ;;  %v959_v25 = vpop.f32.mrf.mxu1 }
 0x47c   :  { %v940_v26 = vadd.f32 %v937_v23, %v916_v22  ;;  %v962_v27 = vadd.f32 %v959_v25, %v941_v24  ;;  %v2739_v24 = vld [vmem:[%s2964_s7 + $0x38] sm:$0x3]  ;;  %v2746_v25 = vld [vmem:[%s2964_s7] sm:$0xff] }
 0x47d   :  { %1208 = vmatpush.msrb.mxu1 %v2746_v25 }
 0x47e   :  { %v1007_v28 = vmul.f32 0.5, %v940_v26  ;;  %v1011_v29 = vmul.f32 0.5, %v962_v27  ;;  %v2751_v26 = vld [vmem:[%s2964_s7 + $0x20] sm:$0xff]  ;;  %v2756_v27 = vld [vmem:[%s2964_s7 + $0x30] sm:$0xff] }
 0x47f   :  { %1260 = vmatpush.msrb.mxu3 %v2751_v26 }
 0x480   :  { %2311 = vtanh.f32 %v1007_v28  ;;  %v2241_v28 = vld [vmem:[%s2962_s6] ss:$0 sm:$0xff] }
 0x481   :  { %2313 = vtanh.f32 %v1011_v29 }
 0x482   :  { %v981_v31 = vpop.f32.mrf.mxu2  ;;  %v1003_v33 = vpop.f32.mrf.mxu3 }
 0x483   :  { %v984_v34 = vadd.f32 %v981_v31, %v963_v30  ;;  %v1006_v35 = vadd.f32 %v1003_v33, %v985_v32  ;;  %v2792_v31 = vld [vmem:[%s2965_s8] ss:$0 sm:$0xff] }
 0x485   :  { %2315 = vtanh.f32 %v984_v34  ;;  %v1016_v36 = vmul.f32 0.5, %v1006_v35  ;;  %v2798_v35 = vld [vmem:[%s2965_s8 + $0x1] ss:$0 sm:$0xff] }
 0x486   :  { %v2312_v37 = vpop.eup %2311 }
 0x487   :  { %v2314_v40 = vpop.eup %2313  ;;  %v1009_v41 = vadd.f32 1.0, %v2312_v37  ;;  %2317 = vtanh.f32 %v1016_v36  ;;  %v2803_v36 = vld [vmem:[%s2965_s8 + $0x3] ss:$0 sm:$0xff]  ;;  %v2808_v37 = vld [vmem:[%s2965_s8 + $0x2] ss:$0 sm:$0xff] }
 0x488   :  { %v1013_v42 = vadd.f32 1.0, %v2314_v40 }
 0x489   :  { %v1010_v45 = vmul.f32 0.5, %v1009_v41 }
 0x48a   :  { %v1014_v48 = vmul.f32 0.5, %v1013_v42 }
 0x48b   :  { %v2316_v49 = vpop.eup %2315 }
 0x48c   :  { %v1020_v50 = vmul.f32 %v1014_v48, %v913_v17  ;;  %v1021_v51 = vmul.f32 %v2316_v49, %v1010_v45 }
 0x48d   :  { %v2318_v52 = vpop.eup %2317 }
 0x48e   :  { %v1022_v53 = vadd.f32 %v1021_v51, %v1020_v50  ;;  %v1018_v54 = vadd.f32 1.0, %v2318_v52 }
 0x490   :  { %2319 = vtanh.f32 %v1022_v53  ;;  %v1019_v55 = vmul.f32 0.5, %v1018_v54 }
 0x496   :  { %v2320_v56 = vpop.eup %2319 }
 0x497   :  { %v1024_v57 = vmul.f32 %v2320_v56, %v1019_v55 }
 0x499   :  { %2148 = vmatmul.msk.f32.vlgmr.msra.gmra.mxu0 %vm130_vm7, %v1024_v57  ;;  %2150 = vmatmul.msk.f32.vlgmr.msra.gmra.mxu1 %vm130_vm7, %v1024_v57 }
 0x49a   :  { %2152 = vmatmul.msk.f32.vlgmr.msrb.gmra.mxu2 %vm130_vm7, %v1024_v57  ;;  %2154 = vmatmul.msk.f32.vlgmr.msra.gmra.mxu3 %vm130_vm7, %v1024_v57 }
 0x49b   :  { %2176 = vmatpush.msk.msrb.mxu2 %vm253_vm3, %v2708_v62  ;;  %2172 = vmatpush.msk.msra.mxu0 %vm253_vm3, %v2739_v24 }
 0x49c   :  { %2174 = vmatpush.msk.msra.mxu1 %vm253_vm3, %v2713_v63  ;;  %2178 = vmatpush.msk.msra.mxu3 %vm253_vm3, %v2727_v1 }
 0x49d   :  { %1348 = vmatpush.msrb.mxu2 %v2718_v0  ;;  %1286 = vmatpush.msra.mxu0 %v2756_v27 }
 0x49e   :  { %1328 = vmatpush.msra.mxu1 %v2746_v25  ;;  %1368 = vmatpush.msra.mxu3 %v2751_v26 }
 0x516   :  { %v1046_v2 = vpop.f32.mrf.mxu0  ;;  %v1068_v44 = vpop.f32.mrf.mxu1 }
 0x517   :  { %v1049_v4 = vadd.f32 %v1046_v2, %v1025_v38  ;;  %v1071_v5 = vadd.f32 %v1068_v44, %v1050_v3 }
 0x519   :  { %v1116_v59 = vmul.f32 0.5, %v1049_v4  ;;  %v1120_v39 = vmul.f32 0.5, %v1071_v5 }
 0x51b   :  { %2321 = vtanh.f32 %v1116_v59 }
 0x51c   :  { %2323 = vtanh.f32 %v1120_v39 }
 0x51d   :  { %v1090_v43 = vpop.f32.mrf.mxu2  ;;  %v1112_v46 = vpop.f32.mrf.mxu3 }
 0x51e   :  { %v1093_v60 = vadd.f32 %v1090_v43, %v1072_v6  ;;  %v1115_v8 = vadd.f32 %v1112_v46, %v1094_v7 }
 0x520   :  { %2325 = vtanh.f32 %v1093_v60  ;;  %v1125_v47 = vmul.f32 0.5, %v1115_v8 }
 0x521   :  { %v2322_v9 = vpop.eup %2321 }
 0x522   :  { %v2324_v10 = vpop.eup %2323  ;;  %v1118_v11 = vadd.f32 1.0, %v2322_v9  ;;  %2327 = vtanh.f32 %v1125_v47 }
 0x523   :  { %v1122_v12 = vadd.f32 1.0, %v2324_v10 }
 0x524   :  { %v1119_v13 = vmul.f32 0.5, %v1118_v11 }
 0x525   :  { %v1123_v14 = vmul.f32 0.5, %v1122_v12 }
 0x526   :  { %v2326_v15 = vpop.eup %2325 }
 0x527   :  { %v1129_v16 = vmul.f32 %v1123_v14, %v1022_v53  ;;  %v1130_v17 = vmul.f32 %v2326_v15, %v1119_v13 }
 0x528   :  { %v2328_v18 = vpop.eup %2327 }
 0x529   :  { %v1131_v19 = vadd.f32 %v1130_v17, %v1129_v16  ;;  %v1127_v20 = vadd.f32 1.0, %v2328_v18 }
 0x52b   :  { %2329 = vtanh.f32 %v1131_v19  ;;  %v1128_v21 = vmul.f32 0.5, %v1127_v20 }
 0x531   :  { %v2330_v22 = vpop.eup %2329 }
 0x532   :  { %v1133_v23 = vmul.f32 %v2330_v22, %v1128_v21 }
 0x534   :  { %2156 = vmatmul.msk.f32.vlgmr.msrb.gmra.mxu0 %vm130_vm7, %v1133_v23 }
 0x535   :  { %2180 = vmatpush.msk.msrb.mxu0 %vm253_vm3, %v2739_v24 }
 0x537   :  { %1388 = vmatpush.msrb.mxu0 %v2756_v27 }
 0x5b1   :  { %v1163_v29 = vpop.f32.mrf.mxu0 }
 0x5b2   :  { %v1164_v30 = vadd.f32 %v2241_v28, %v1163_v29 }
 0x5b4   :  { %2167 = vmatmul.msk.f32.vlgmr.msrb.gmra.mxu1 %vm130_vm7, %v1164_v30  ;;  %2169 = vmatmul.msk.f32.vlgmr.msra.gmra.mxu2 %vm130_vm7, %v1164_v30 }
 0x5b5   :  { %2171 = vmatmul.msk.f32.vlgmr.msrb.gmra.mxu3 %vm130_vm7, %v1164_v30  ;;  %2173 = vmatmul.msk.f32.vlgmr.msra.gmra.mxu0 %vm130_vm7, %v1164_v30 }
 0x5b6   :  { %2184 = vmatpush.msk.msra.mxu2 %vm253_vm3, %v2708_v62  ;;  %2182 = vmatpush.msk.msrb.mxu1 %vm253_vm3, %v2713_v63 }
 0x5b7   :  { %2186 = vmatpush.msk.msrb.mxu3 %vm253_vm3, %v2727_v1  ;;  %2188 = vmatpush.msk.msra.mxu0 %vm253_vm3, %v2739_v24 }
 0x5b8   :  { %1450 = vmatpush.msra.mxu2 %v2718_v0  ;;  %1430 = vmatpush.msrb.mxu1 %v2746_v25 }
 0x5b9   :  { %1470 = vmatpush.msrb.mxu3 %v2751_v26  ;;  %1490 = vmatpush.msra.mxu0 %v2756_v27 }
 0x631   :  { %v1210_v32 = vpop.f32.mrf.mxu1 }
 0x632   :  { %v1211_v33 = vadd.f32 %v2792_v31, %v1210_v32  ;;  %v1288_v40 = vpop.f32.mrf.mxu0 }
 0x633   :  { %v1289_v48 = vadd.f32 %v2803_v36, %v1288_v40 }
 0x634   :  { %v1291_v34 = vmul.f32 0.5, %v1211_v33 }
 0x635   :  { %v1300_v53 = vmul.f32 0.5, %v1289_v48 }
 0x636   :  { %2331 = vtanh.f32 %v1291_v34 }
 0x637   :  { %v1236_v41 = vpop.f32.mrf.mxu2 }
 0x638   :  { %v1237_v42 = vadd.f32 %v2798_v35, %v1236_v41  ;;  %v1262_v45 = vpop.f32.mrf.mxu3 }
 0x639   :  { %v1263_v49 = vadd.f32 %v2808_v37, %v1262_v45 }
 0x63a   :  { %v1295_v50 = vmul.f32 0.5, %v1237_v42 }
 0x63b   :  { %2333 = vtanh.f32 %v1263_v49 }
 0x63c   :  { %v2332_v51 = vpop.eup %2331  ;;  %2335 = vtanh.f32 %v1295_v50 }
 0x63d   :  { %v1293_v52 = vadd.f32 1.0, %v2332_v51  ;;  %2337 = vtanh.f32 %v1300_v53 }
 0x63f   :  { %v1294_v55 = vmul.f32 0.5, %v1293_v52 }
 0x641   :  { %v2334_v54 = vpop.eup %2333 }
 0x642   :  { %v2336_v56 = vpop.eup %2335  ;;  %v1304_v61 = vmul.f32 %v2334_v54, %v1294_v55 }
 0x643   :  { %v1297_v57 = vadd.f32 1.0, %v2336_v56  ;;  %v2338_v38 = vpop.eup %2337 }
 0x644   :  { %v1302_v3 = vadd.f32 1.0, %v2338_v38 }
 0x645   :  { %v1298_v58 = vmul.f32 0.5, %v1297_v57 }
 0x646   :  { %v1303_v44 = vmul.f32 0.5, %v1302_v3 }
 0x647   :  { %v1305_v2 = vadd.f32 %v1304_v61, %v1298_v58 }
 0x649   :  { %2339 = vtanh.f32 %v1305_v2 }
 0x64f   :  { %v2340_v4 = vpop.eup %2339 }
 0x650   :  { %v1307_v5 = vmul.f32 %v2340_v4, %v1303_v44 }
 0x652   :  { %1309 = vst.msk [vmem:[#allocation6] sm:$0x3] %vm1308_vm8, %v1307_v5  ;;  %2175 = vmatmul.msk.f32.vlgmr.msra.gmra.mxu1 %vm130_vm7, %v1307_v5  ;;  %2177 = vmatmul.msk.f32.vlgmr.msrb.gmra.mxu2 %vm130_vm7, %v1307_v5 }
 0x653   :  { %2179 = vmatmul.msk.f32.vlgmr.msra.gmra.mxu3 %vm130_vm7, %v1307_v5  ;;  %2181 = vmatmul.msk.f32.vlgmr.msrb.gmra.mxu0 %vm130_vm7, %v1307_v5 }
 0x654   :  { %2192 = vmatpush.msk.msrb.mxu2 %vm253_vm3, %v2708_v62  ;;  %2190 = vmatpush.msk.msra.mxu1 %vm253_vm3, %v2713_v63 }
 0x655   :  { %2194 = vmatpush.msk.msra.mxu3 %vm253_vm3, %v2727_v1  ;;  %2196 = vmatpush.msk.msrb.mxu0 %vm253_vm3, %v2739_v24 }
 0x656   :  { %1552 = vmatpush.msrb.mxu2 %v2718_v0  ;;  %1532 = vmatpush.msra.mxu1 %v2746_v25 }
 0x657   :  { %1572 = vmatpush.msra.mxu3 %v2751_v26  ;;  %1592 = vmatpush.msrb.mxu0 %v2756_v27 }
 0x6cf   :  { %v1330_v59 = vpop.f32.mrf.mxu1 }
 0x6d0   :  { %v1331_v39 = vadd.f32 %v2792_v31, %v1330_v59  ;;  %v1390_v7 = vpop.f32.mrf.mxu0 }
 0x6d1   :  { %v1391_v9 = vadd.f32 %v2803_v36, %v1390_v7 }
 0x6d2   :  { %v1393_v6 = vmul.f32 0.5, %v1331_v39 }
 0x6d3   :  { %v1402_v12 = vmul.f32 0.5, %v1391_v9 }
 0x6d4   :  { %2341 = vtanh.f32 %v1393_v6 }
 0x6d5   :  { %v1350_v43 = vpop.f32.mrf.mxu2 }
 0x6d6   :  { %v1351_v46 = vadd.f32 %v2798_v35, %v1350_v43  ;;  %v1370_v60 = vpop.f32.mrf.mxu3 }
 0x6d7   :  { %v1371_v47 = vadd.f32 %v2808_v37, %v1370_v60 }
 0x6d8   :  { %v1397_v8 = vmul.f32 0.5, %v1351_v46 }
 0x6da   :  { %v2342_v10 = vpop.eup %2341  ;;  %2343 = vtanh.f32 %v1397_v8 }
 0x6db   :  { %2345 = vtanh.f32 %v1371_v47  ;;  %v1395_v11 = vadd.f32 1.0, %v2342_v10 }
 0x6dc   :  { %2347 = vtanh.f32 %v1402_v12 }
 0x6dd   :  { %v1396_v14 = vmul.f32 0.5, %v1395_v11 }
 0x6e0   :  { %v2344_v13 = vpop.eup %2343 }
 0x6e1   :  { %v1399_v15 = vadd.f32 1.0, %v2344_v13  ;;  %v2346_v16 = vpop.eup %2345 }
 0x6e2   :  { %v1407_v19 = vmul.f32 %v2346_v16, %v1396_v14  ;;  %v2348_v20 = vpop.eup %2347 }
 0x6e3   :  { %v1400_v17 = vmul.f32 0.5, %v1399_v15  ;;  %v1404_v22 = vadd.f32 1.0, %v2348_v20 }
 0x6e5   :  { %v1406_v18 = vmul.f32 %v1400_v17, %v1305_v2  ;;  %v1405_v23 = vmul.f32 0.5, %v1404_v22 }
 0x6e7   :  { %v1408_v21 = vadd.f32 %v1407_v19, %v1406_v18 }
 0x6e9   :  { %2349 = vtanh.f32 %v1408_v21 }
 0x6ef   :  { %v2350_v28 = vpop.eup %2349 }
 0x6f0   :  { %v1410_v29 = vmul.f32 %v2350_v28, %v1405_v23 }
 0x6f2   :  { %1411 = vst.msk [vmem:[#allocation6 + $0x2] sm:$0x3] %vm1308_vm8, %v1410_v29  ;;  %2183 = vmatmul.msk.f32.vlgmr.msrb.gmra.mxu1 %vm130_vm7, %v1410_v29  ;;  %2185 = vmatmul.msk.f32.vlgmr.msra.gmra.mxu2 %vm130_vm7, %v1410_v29 }
 0x6f3   :  { %2187 = vmatmul.msk.f32.vlgmr.msrb.gmra.mxu3 %vm130_vm7, %v1410_v29  ;;  %2189 = vmatmul.msk.f32.vlgmr.msra.gmra.mxu0 %vm130_vm7, %v1410_v29 }
 0x6f4   :  { %2200 = vmatpush.msk.msra.mxu2 %vm253_vm3, %v2708_v62  ;;  %2198 = vmatpush.msk.msrb.mxu1 %vm253_vm3, %v2713_v63 }
 0x6f5   :  { %2202 = vmatpush.msk.msrb.mxu3 %vm253_vm3, %v2727_v1  ;;  %2204 = vmatpush.msk.msra.mxu0 %vm253_vm3, %v2739_v24 }
 0x6f6   :  { %1654 = vmatpush.msra.mxu2 %v2718_v0  ;;  %1634 = vmatpush.msrb.mxu1 %v2746_v25 }
 0x6f7   :  { %1674 = vmatpush.msrb.mxu3 %v2751_v26  ;;  %1694 = vmatpush.msra.mxu0 %v2756_v27 }
 0x76f   :  { %v1432_v30 = vpop.f32.mrf.mxu1 }
 0x770   :  { %v1433_v32 = vadd.f32 %v2792_v31, %v1432_v30  ;;  %v1492_v40 = vpop.f32.mrf.mxu0 }
 0x771   :  { %v1493_v49 = vadd.f32 %v2803_v36, %v1492_v40 }
 0x772   :  { %v1495_v33 = vmul.f32 0.5, %v1433_v32 }
 0x773   :  { %v1504_v52 = vmul.f32 0.5, %v1493_v49 }
 0x774   :  { %2351 = vtanh.f32 %v1495_v33 }
 0x775   :  { %v1452_v34 = vpop.f32.mrf.mxu2 }
 0x776   :  { %v1453_v41 = vadd.f32 %v2798_v35, %v1452_v34  ;;  %v1472_v42 = vpop.f32.mrf.mxu3 }
 0x777   :  { %v1473_v48 = vadd.f32 %v2808_v37, %v1472_v42 }
 0x778   :  { %v1499_v45 = vmul.f32 0.5, %v1453_v41 }
 0x77a   :  { %v2352_v50 = vpop.eup %2351  ;;  %2353 = vtanh.f32 %v1499_v45 }
 0x77b   :  { %2355 = vtanh.f32 %v1473_v48  ;;  %v1497_v51 = vadd.f32 1.0, %v2352_v50 }
 0x77c   :  { %2357 = vtanh.f32 %v1504_v52 }
 0x77d   :  { %v1498_v54 = vmul.f32 0.5, %v1497_v51 }
 0x780   :  { %v2354_v53 = vpop.eup %2353 }
 0x781   :  { %v1501_v55 = vadd.f32 1.0, %v2354_v53  ;;  %v2356_v56 = vpop.eup %2355 }
 0x782   :  { %v1509_v61 = vmul.f32 %v2356_v56, %v1498_v54  ;;  %v2358_v38 = vpop.eup %2357 }
 0x783   :  { %v1502_v57 = vmul.f32 0.5, %v1501_v55  ;;  %v1506_v3 = vadd.f32 1.0, %v2358_v38 }
 0x785   :  { %v1508_v58 = vmul.f32 %v1502_v57, %v1408_v21  ;;  %v1507_v44 = vmul.f32 0.5, %v1506_v3 }
 0x787   :  { %v1510_v2 = vadd.f32 %v1509_v61, %v1508_v58 }
 0x789   :  { %2359 = vtanh.f32 %v1510_v2 }
 0x78f   :  { %v2360_v4 = vpop.eup %2359 }
 0x790   :  { %v1512_v5 = vmul.f32 %v2360_v4, %v1507_v44 }
 0x792   :  { %1513 = vst.msk [vmem:[#allocation6 + $0x4] sm:$0x3] %vm1308_vm8, %v1512_v5  ;;  %2191 = vmatmul.msk.f32.vlgmr.msra.gmra.mxu1 %vm130_vm7, %v1512_v5  ;;  %2193 = vmatmul.msk.f32.vlgmr.msrb.gmra.mxu2 %vm130_vm7, %v1512_v5 }
 0x793   :  { %2195 = vmatmul.msk.f32.vlgmr.msra.gmra.mxu3 %vm130_vm7, %v1512_v5  ;;  %2197 = vmatmul.msk.f32.vlgmr.msrb.gmra.mxu0 %vm130_vm7, %v1512_v5 }
 0x794   :  { %2208 = vmatpush.msk.msrb.mxu2 %vm253_vm3, %v2708_v62  ;;  %2206 = vmatpush.msk.msra.mxu1 %vm253_vm3, %v2713_v63 }
 0x795   :  { %2210 = vmatpush.msk.msra.mxu3 %vm253_vm3, %v2727_v1  ;;  %2212 = vmatpush.msk.msrb.mxu0 %vm253_vm3, %v2739_v24 }
 0x796   :  { %1756 = vmatpush.msrb.mxu2 %v2718_v0  ;;  %1736 = vmatpush.msra.mxu1 %v2746_v25 }
 0x797   :  { %1776 = vmatpush.msra.mxu3 %v2751_v26  ;;  %1796 = vmatpush.msrb.mxu0 %v2756_v27 }
 0x80f   :  { %v1534_v59 = vpop.f32.mrf.mxu1 }
 0x810   :  { %v1535_v39 = vadd.f32 %v2792_v31, %v1534_v59  ;;  %v1594_v7 = vpop.f32.mrf.mxu0 }
 0x811   :  { %v1595_v9 = vadd.f32 %v2803_v36, %v1594_v7 }
 0x812   :  { %v1597_v6 = vmul.f32 0.5, %v1535_v39 }
 0x813   :  { %v1606_v12 = vmul.f32 0.5, %v1595_v9 }
 0x814   :  { %2361 = vtanh.f32 %v1597_v6 }
 0x815   :  { %v1554_v43 = vpop.f32.mrf.mxu2 }
 0x816   :  { %v1555_v46 = vadd.f32 %v2798_v35, %v1554_v43  ;;  %v1574_v60 = vpop.f32.mrf.mxu3 }
 0x817   :  { %v1575_v47 = vadd.f32 %v2808_v37, %v1574_v60 }
 0x818   :  { %v1601_v8 = vmul.f32 0.5, %v1555_v46 }
 0x81a   :  { %v2362_v10 = vpop.eup %2361  ;;  %2363 = vtanh.f32 %v1601_v8 }
 0x81b   :  { %2365 = vtanh.f32 %v1575_v47  ;;  %v1599_v11 = vadd.f32 1.0, %v2362_v10 }
 0x81c   :  { %2367 = vtanh.f32 %v1606_v12 }
 0x81d   :  { %v1600_v14 = vmul.f32 0.5, %v1599_v11 }
 0x820   :  { %v2364_v13 = vpop.eup %2363 }
 0x821   :  { %v1603_v15 = vadd.f32 1.0, %v2364_v13  ;;  %v2366_v16 = vpop.eup %2365 }
 0x822   :  { %v1611_v19 = vmul.f32 %v2366_v16, %v1600_v14  ;;  %v2368_v20 = vpop.eup %2367 }
 0x823   :  { %v1604_v17 = vmul.f32 0.5, %v1603_v15  ;;  %v1608_v22 = vadd.f32 1.0, %v2368_v20 }
 0x825   :  { %v1610_v18 = vmul.f32 %v1604_v17, %v1510_v2  ;;  %v1609_v23 = vmul.f32 0.5, %v1608_v22  ;;  %v2026_v22 = vld [vmem:[%s2966_s9] sm:$0xff] }
 0x827   :  { %v1612_v21 = vadd.f32 %v1611_v19, %v1610_v18 }
 0x829   :  { %2369 = vtanh.f32 %v1612_v21 }
 0x82f   :  { %v2370_v28 = vpop.eup %2369 }
 0x830   :  { %v1614_v29 = vmul.f32 %v2370_v28, %v1609_v23 }
 0x832   :  { %1615 = vst.msk [vmem:[#allocation6 + $0x6] sm:$0x3] %vm1308_vm8, %v1614_v29  ;;  %2199 = vmatmul.msk.f32.vlgmr.msrb.gmra.mxu1 %vm130_vm7, %v1614_v29  ;;  %2201 = vmatmul.msk.f32.vlgmr.msra.gmra.mxu2 %vm130_vm7, %v1614_v29 }
 0x833   :  { %2203 = vmatmul.msk.f32.vlgmr.msrb.gmra.mxu3 %vm130_vm7, %v1614_v29  ;;  %2205 = vmatmul.msk.f32.vlgmr.msra.gmra.mxu0 %vm130_vm7, %v1614_v29 }
 0x834   :  { %2216 = vmatpush.msk.msra.mxu2 %vm253_vm3, %v2708_v62  ;;  %2214 = vmatpush.msk.msrb.mxu1 %vm253_vm3, %v2713_v63 }
 0x835   :  { %2218 = vmatpush.msk.msrb.mxu3 %vm253_vm3, %v2727_v1  ;;  %2220 = vmatpush.msk.msra.mxu0 %vm253_vm3, %v2739_v24 }
 0x836   :  { %1858 = vmatpush.msra.mxu2 %v2718_v0  ;;  %1838 = vmatpush.msrb.mxu1 %v2746_v25 }
 0x837   :  { %1878 = vmatpush.msrb.mxu3 %v2751_v26  ;;  %1898 = vmatpush.msra.mxu0 %v2756_v27 }
 0x8af   :  { %v1636_v30 = vpop.f32.mrf.mxu1 }
 0x8b0   :  { %v1637_v32 = vadd.f32 %v2792_v31, %v1636_v30  ;;  %v1696_v40 = vpop.f32.mrf.mxu0 }
 0x8b1   :  { %v1697_v49 = vadd.f32 %v2803_v36, %v1696_v40 }
 0x8b2   :  { %v1699_v33 = vmul.f32 0.5, %v1637_v32 }
 0x8b3   :  { %v1708_v52 = vmul.f32 0.5, %v1697_v49 }
 0x8b4   :  { %2371 = vtanh.f32 %v1699_v33 }
 0x8b5   :  { %v1656_v34 = vpop.f32.mrf.mxu2 }
 0x8b6   :  { %v1657_v41 = vadd.f32 %v2798_v35, %v1656_v34  ;;  %v1676_v42 = vpop.f32.mrf.mxu3 }
 0x8b7   :  { %v1677_v48 = vadd.f32 %v2808_v37, %v1676_v42 }
 0x8b8   :  { %v1703_v45 = vmul.f32 0.5, %v1657_v41 }
 0x8ba   :  { %v2372_v50 = vpop.eup %2371  ;;  %2373 = vtanh.f32 %v1703_v45 }
 0x8bb   :  { %2375 = vtanh.f32 %v1677_v48  ;;  %v1701_v51 = vadd.f32 1.0, %v2372_v50 }
 0x8bc   :  { %2377 = vtanh.f32 %v1708_v52 }
 0x8bd   :  { %v1702_v54 = vmul.f32 0.5, %v1701_v51 }
 0x8c0   :  { %v2374_v53 = vpop.eup %2373 }
 0x8c1   :  { %v1705_v55 = vadd.f32 1.0, %v2374_v53  ;;  %v2376_v56 = vpop.eup %2375 }
 0x8c2   :  { %v1713_v61 = vmul.f32 %v2376_v56, %v1702_v54  ;;  %v2378_v38 = vpop.eup %2377 }
 0x8c3   :  { %v1706_v57 = vmul.f32 0.5, %v1705_v55  ;;  %v1710_v3 = vadd.f32 1.0, %v2378_v38  ;;  %v2024_v38 = vld [vmem:[#allocation6] sm:$0xff] }
 0x8c5   :  { %v1712_v58 = vmul.f32 %v1706_v57, %v1612_v21  ;;  %v1711_v44 = vmul.f32 0.5, %v1710_v3  ;;  %v2027_v21 = vld [vmem:[%s2966_s9 + $0x8] sm:$0x3] }
 0x8c7   :  { %v1714_v2 = vadd.f32 %v1713_v61, %v1712_v58 }
 0x8c9   :  { %2379 = vtanh.f32 %v1714_v2 }
 0x8cf   :  { %v2380_v4 = vpop.eup %2379 }
 0x8d0   :  { %v1716_v5 = vmul.f32 %v2380_v4, %v1711_v44  ;;  %v2246_v4 = vld [vmem:[%s2967_s10] ss:$0 sm:$0xff] }
 0x8d2   :  { %1717 = vst.msk [vmem:[#allocation6 + $0x8] sm:$0x3] %vm1308_vm8, %v1716_v5  ;;  %2207 = vmatmul.msk.f32.vlgmr.msra.gmra.mxu1 %vm130_vm7, %v1716_v5  ;;  %2209 = vmatmul.msk.f32.vlgmr.msrb.gmra.mxu2 %vm130_vm7, %v1716_v5 }
 0x8d3   :  { %2211 = vmatmul.msk.f32.vlgmr.msra.gmra.mxu3 %vm130_vm7, %v1716_v5  ;;  %2213 = vmatmul.msk.f32.vlgmr.msrb.gmra.mxu0 %vm130_vm7, %v1716_v5 }
 0x8d4   :  { %2224 = vmatpush.msk.msrb.mxu2 %vm253_vm3, %v2708_v62  ;;  %2222 = vmatpush.msk.msra.mxu1 %vm253_vm3, %v2713_v63 }
 0x8d5   :  { %2226 = vmatpush.msk.msra.mxu3 %vm253_vm3, %v2727_v1  ;;  %2228 = vmatpush.msk.msrb.mxu0 %vm253_vm3, %v2739_v24 }
 0x8d6   :  { %1960 = vmatpush.msrb.mxu2 %v2718_v0  ;;  %1940 = vmatpush.msra.mxu1 %v2746_v25 }
 0x8d7   :  { %1980 = vmatpush.msra.mxu3 %v2751_v26  ;;  %2000 = vmatpush.msrb.mxu0 %v2756_v27 }
 0x94f   :  { %v1738_v59 = vpop.f32.mrf.mxu1 }
 0x950   :  { %v1739_v62 = vadd.f32 %v2792_v31, %v1738_v59  ;;  %v1798_v6 = vpop.f32.mrf.mxu0 }
 0x951   :  { %v1799_v0 = vadd.f32 %v2803_v36, %v1798_v6 }
 0x952   :  { %v1801_v39 = vmul.f32 0.5, %v1739_v62 }
 0x953   :  { %v1810_v27 = vmul.f32 0.5, %v1799_v0 }
 0x954   :  { %2381 = vtanh.f32 %v1801_v39 }
 0x955   :  { %v1758_v63 = vpop.f32.mrf.mxu2 }
 0x956   :  { %v1759_v1 = vadd.f32 %v2798_v35, %v1758_v63  ;;  %v1778_v43 = vpop.f32.mrf.mxu3 }
 0x957   :  { %v1779_v24 = vadd.f32 %v2808_v37, %v1778_v43 }
 0x958   :  { %v1805_v7 = vmul.f32 0.5, %v1759_v1 }
 0x95a   :  { %v2382_v25 = vpop.eup %2381  ;;  %2383 = vtanh.f32 %v1805_v7 }
 0x95b   :  { %2385 = vtanh.f32 %v1779_v24  ;;  %v1803_v26 = vadd.f32 1.0, %v2382_v25 }
 0x95c   :  { %2387 = vtanh.f32 %v1810_v27 }
 0x95d   :  { %v1804_v60 = vmul.f32 0.5, %v1803_v26 }
 0x960   :  { %v2384_v46 = vpop.eup %2383 }
 0x961   :  { %v1807_v8 = vadd.f32 1.0, %v2384_v46  ;;  %v2386_v47 = vpop.eup %2385 }
 0x962   :  { %v1815_v11 = vmul.f32 %v2386_v47, %v1804_v60  ;;  %v2388_v12 = vpop.eup %2387 }
 0x963   :  { %v1808_v9 = vmul.f32 0.5, %v1807_v8  ;;  %v1812_v14 = vadd.f32 1.0, %v2388_v12 }
 0x965   :  { %v1814_v10 = vmul.f32 %v1808_v9, %v1714_v2  ;;  %v1813_v15 = vmul.f32 0.5, %v1812_v14 }
 0x967   :  { %v1816_v13 = vadd.f32 %v1815_v11, %v1814_v10 }
 0x969   :  { %2389 = vtanh.f32 %v1816_v13 }
 0x96f   :  { %v2390_v16 = vpop.eup %2389 }
 0x970   :  { %v1818_v17 = vmul.f32 %v2390_v16, %v1813_v15 }
 0x972   :  { %1819 = vst.msk [vmem:[#allocation6 + $0xa] sm:$0x3] %vm1308_vm8, %v1818_v17  ;;  %2215 = vmatmul.msk.f32.vlgmr.msrb.gmra.mxu1 %vm130_vm7, %v1818_v17  ;;  %2217 = vmatmul.msk.f32.vlgmr.msra.gmra.mxu2 %vm130_vm7, %v1818_v17 }
 0x973   :  { %2219 = vmatmul.msk.f32.vlgmr.msrb.gmra.mxu3 %vm130_vm7, %v1818_v17  ;;  %2221 = vmatmul.msk.f32.vlgmr.msra.gmra.mxu0 %vm130_vm7, %v1818_v17 }
 0x974   :  { %2230 = vmatpush.msk.msrb.mxu1 %vm253_vm3, %v2027_v21 }
 0x976   :  { %2056 = vmatpush.msrb.mxu1 %v2026_v22 }
 0x9ef   :  { %v1840_v18 = vpop.f32.mrf.mxu1 }
 0x9f0   :  { %v1841_v19 = vadd.f32 %v2792_v31, %v1840_v18  ;;  %v1900_v28 = vpop.f32.mrf.mxu0 }
 0x9f1   :  { %v1901_v34 = vadd.f32 %v2803_v36, %v1900_v28 }
 0x9f2   :  { %v1903_v20 = vmul.f32 0.5, %v1841_v19 }
 0x9f3   :  { %v1912_v42 = vmul.f32 0.5, %v1901_v34 }
 0x9f4   :  { %2391 = vtanh.f32 %v1903_v20 }
 0x9f5   :  { %v1860_v23 = vpop.f32.mrf.mxu2 }
 0x9f6   :  { %v1861_v29 = vadd.f32 %v2798_v35, %v1860_v23  ;;  %v1880_v30 = vpop.f32.mrf.mxu3 }
 0x9f7   :  { %v1881_v33 = vadd.f32 %v2808_v37, %v1880_v30 }
 0x9f8   :  { %v1907_v32 = vmul.f32 0.5, %v1861_v29 }
 0x9fa   :  { %v2392_v40 = vpop.eup %2391  ;;  %2393 = vtanh.f32 %v1907_v32 }
 0x9fb   :  { %2395 = vtanh.f32 %v1881_v33  ;;  %v1905_v41 = vadd.f32 1.0, %v2392_v40 }
 0x9fc   :  { %2397 = vtanh.f32 %v1912_v42 }
 0x9fd   :  { %v1906_v48 = vmul.f32 0.5, %v1905_v41 }
 0xa00   :  { %v2394_v45 = vpop.eup %2393 }
 0xa01   :  { %v1909_v49 = vadd.f32 1.0, %v2394_v45  ;;  %v2396_v50 = vpop.eup %2395 }
 0xa02   :  { %v1917_v53 = vmul.f32 %v2396_v50, %v1906_v48  ;;  %v2398_v54 = vpop.eup %2397 }
 0xa03   :  { %v1910_v51 = vmul.f32 0.5, %v1909_v49  ;;  %v1914_v56 = vadd.f32 1.0, %v2398_v54 }
 0xa05   :  { %v1916_v52 = vmul.f32 %v1910_v51, %v1816_v13  ;;  %v1915_v57 = vmul.f32 0.5, %v1914_v56 }
 0xa07   :  { %v1918_v55 = vadd.f32 %v1917_v53, %v1916_v52 }
 0xa09   :  { %2399 = vtanh.f32 %v1918_v55 }
 0xa0f   :  { %v2400_v58 = vpop.eup %2399 }
 0xa10   :  { %v1920_v61 = vmul.f32 %v2400_v58, %v1915_v57 }
 0xa12   :  { %1921 = vst.msk [vmem:[#allocation6 + $0xc] sm:$0x3] %vm1308_vm8, %v1920_v61  ;;  %2223 = vmatmul.msk.f32.vlgmr.msra.gmra.mxu1 %vm130_vm7, %v1920_v61  ;;  %2225 = vmatmul.msk.f32.vlgmr.msrb.gmra.mxu2 %vm130_vm7, %v1920_v61 }
 0xa13   :  { %2227 = vmatmul.msk.f32.vlgmr.msra.gmra.mxu3 %vm130_vm7, %v1920_v61  ;;  %2229 = vmatmul.msk.f32.vlgmr.msrb.gmra.mxu0 %vm130_vm7, %v1920_v61 }
 0xa1a   :  { %2231 = vmatmul.msk.f32.vlgmr.msrb.gmra.mxu1 %vm130_vm7, %v2024_v38 }
 0xa8f   :  { %v1942_v2 = vpop.f32.mrf.mxu1 }
 0xa90   :  { %v1943_v3 = vadd.f32 %v2792_v31, %v1942_v2  ;;  %v2002_v59 = vpop.f32.mrf.mxu0 }
 0xa91   :  { %v2003_v7 = vadd.f32 %v2803_v36, %v2002_v59 }
 0xa92   :  { %v2005_v44 = vmul.f32 0.5, %v1943_v3 }
 0xa93   :  { %v2014_v0 = vmul.f32 0.5, %v2003_v7 }
 0xa94   :  { %2401 = vtanh.f32 %v2005_v44 }
 0xa95   :  { %v1962_v5 = vpop.f32.mrf.mxu2 }
 0xa96   :  { %v1963_v62 = vadd.f32 %v2798_v35, %v1962_v5  ;;  %v1982_v39 = vpop.f32.mrf.mxu3 }
 0xa97   :  { %v2058_v63 = vpop.f32.mrf.mxu1  ;;  %v1983_v1 = vadd.f32 %v2808_v37, %v1982_v39 }
 0xa98   :  { %v2009_v6 = vmul.f32 0.5, %v1963_v62  ;;  %v2059_v43 = vadd.f32 %v2246_v4, %v2058_v63 }
 0xa9a   :  { %v2402_v31 = vpop.eup %2401  ;;  %2403 = vtanh.f32 %v2009_v6  ;;  %2065 = vst.msk [vmem:[%s2968_s11] sm:$0xff] %vm2064_vm9, %v2059_v43 }
 0xa9b   :  { %2405 = vtanh.f32 %v1983_v1  ;;  %v2007_v24 = vadd.f32 1.0, %v2402_v31 }
 0xa9c   :  { %2407 = vtanh.f32 %v2014_v0 }
 0xa9d   :  { %v2008_v25 = vmul.f32 0.5, %v2007_v24 }
 0xaa0   :  { %v2404_v35 = vpop.eup %2403 }
 0xaa1   :  { %v2011_v26 = vadd.f32 1.0, %v2404_v35  ;;  %v2406_v27 = vpop.eup %2405 }
 0xaa2   :  { %v2019_v60 = vmul.f32 %v2406_v27, %v2008_v25  ;;  %v2408_v8 = vpop.eup %2407 }
 0xaa3   :  { %v2012_v46 = vmul.f32 0.5, %v2011_v26  ;;  %v2016_v47 = vadd.f32 1.0, %v2408_v8 }
 0xaa5   :  { %v2018_v37 = vmul.f32 %v2012_v46, %v1918_v55  ;;  %v2017_v9 = vmul.f32 0.5, %v2016_v47 }
 0xaa7   :  { %v2020_v36 = vadd.f32 %v2019_v60, %v2018_v37 }
 0xaa9   :  { %2409 = vtanh.f32 %v2020_v36 }
 0xaaf   :  { %v2410_v10 = vpop.eup %2409 }
 0xab0   :  { %v2022_v11 = vmul.f32 %v2410_v10, %v2017_v9 }
 0xab2   :  { %2023 = vst.msk [vmem:[#allocation6 + $0xe] sm:$0x3] %vm1308_vm8, %v2022_v11 }
 0xab9   :  { %v2025_v12 = vld [vmem:[#allocation6 + $0x8] sm:$0xff] }
 0xaba   :  { %2232 = vmatmul.msk.f32.gmra.mxu1 %vm130_vm7, %v2025_v12 }
 0xb37   :  { %v2061_v13 = vpop.f32.mrf.mxu1 }
 0xb38   :  { %v2062_v14 = vadd.f32 %v2246_v4, %v2061_v13 }
 0xb3a   :  { %2066 = vst.msk [vmem:[%s2968_s11 + $0x8] sm:$0xff] %vm2064_vm9, %v2062_v14 }

</bundles_post_ra>
